<compile_context>
chip_gen: v7x
topology: tpu7x:2x2x1
jax: 0.10.0
libtpu: 0.0.40
codegen_flags: <defaults>
</compile_context>

<pallas_src>
import functools
import math

import jax
import jax.numpy as jnp
from jax.experimental import pallas as pl

# ---- small, forward-consistent hyper-parameters ----
NUM_FRAMES = 8      # sequence length (frames)
BATCH = 2
D_MODEL = 32
NUM_HEAD = 4
NUM_LAYERS = 2
DIM_FF = 64
EPS = 1e-5


# ---------------------------------------------------------------------------
# Fused forward kernel (no grid: everything resident in VMEM for one call)
# ---------------------------------------------------------------------------
def fused_forward_kernel(x_ref, pe_ref,
                         wqkv_ref, bqkv_ref, wo_ref, bo_ref,
                         ln1w_ref, ln1b_ref, w1_ref, b1_ref, w2_ref, b2_ref,
                         ln2w_ref, ln2b_ref,
                         dw_ref, db_ref, g_ref, o_ref,
                         *, num_layers, num_head, head_dim, batch):
    # positional-encoding add; rows are in (frame, batch) order
    x = x_ref[...] + pe_ref[...]                       # (R, D), R = F*B
    R, D = x.shape
    scale = 1.0 / math.sqrt(head_dim)

    # same-batch attention mask (constant, hoisted out of the layer/head loops)
    rb = jax.lax.broadcasted_iota(jnp.int32, (R, R), 0) % batch
    cb = jax.lax.broadcasted_iota(jnp.int32, (R, R), 1) % batch
    same_batch = rb == cb
    neg_big = jnp.float32(-1e30)

    for l in range(num_layers):
        # ---- multi-head self-attention (fused QKV, pre-transposed weights) ----
        qkv = jnp.dot(x, wqkv_ref[l], preferred_element_type=jnp.float32) + bqkv_ref[l]
        q = qkv[:, :D] * scale
        k = qkv[:, D:2 * D]
        v = qkv[:, 2 * D:]
        wo = wo_ref[l]                                  # (D, D), already W_o^T

        attn = jnp.zeros((R, D), jnp.float32)
        for h in range(num_head):
            sl = slice(h * head_dim, (h + 1) * head_dim)
            # q_h @ k_h^T without an explicit transpose (contract on last dims)
            s = jax.lax.dot_general(q[:, sl], k[:, sl],
                                    (((1,), (1,)), ((), ())),
                                    preferred_element_type=jnp.float32)   # (R, R)
            s = jnp.where(same_batch, s, neg_big)
            s = s - jnp.max(s, axis=-1, keepdims=True)
            p = jnp.exp(s)
            p = p * pl.reciprocal(jnp.sum(p, axis=-1, keepdims=True), approx=True)
            pv = jnp.dot(p, v[:, sl], preferred_element_type=jnp.float32)  # (R, hd)
            # out-projection folded into the head loop (no concatenate)
            attn = attn + jnp.dot(pv, wo[sl, :], preferred_element_type=jnp.float32)
        attn = attn + bo_ref[l]

        # ---- residual + LayerNorm 1 (post-norm) ----
        y = x + attn
        mu = jnp.mean(y, axis=-1, keepdims=True)
        var = jnp.mean((y - mu) ** 2, axis=-1, keepdims=True)
        y = (y - mu) * jax.lax.rsqrt(var + EPS) * ln1w_ref[l] + ln1b_ref[l]

        # ---- feed-forward (relu) ----
        h1 = jnp.dot(y, w1_ref[l], preferred_element_type=jnp.float32) + b1_ref[l]
        h1 = jnp.maximum(h1, 0.0)
        h2 = jnp.dot(h1, w2_ref[l], preferred_element_type=jnp.float32) + b2_ref[l]

        # ---- residual + LayerNorm 2 ----
        z = y + h2
        mu2 = jnp.mean(z, axis=-1, keepdims=True)
        var2 = jnp.mean((z - mu2) ** 2, axis=-1, keepdims=True)
        x = (z - mu2) * jax.lax.rsqrt(var2 + EPS) * ln2w_ref[l] + ln2b_ref[l]

    # ---- decoder: Linear(F*D -> 1) applied to x.contiguous().view(-1, F*D) ----
    # dw_ref holds the decoder weight tiled per activation row; g_ref sums the
    # F consecutive rows that make up each decoder row -> no in-kernel reshape.
    prod = x * dw_ref[...]                                                 # (R, D)
    gp = jnp.dot(g_ref[...], prod, preferred_element_type=jnp.float32)     # (B, D)
    logits = jnp.sum(gp, axis=-1, keepdims=True) + db_ref[...]             # (B, 1)

    # ---- softmax over the flattened logits (the batch axis) ----
    m = jnp.max(logits, axis=0, keepdims=True)
    e = jnp.exp(logits - m)
    o_ref[...] = e / jnp.sum(e, axis=0, keepdims=True)                     # (B, 1)


def frame_scoring_forward(lg_attention, pe_rows, packed, dec_w_tiled, dec_b, gmat,
                          *, num_head):
    """lg_attention: (F, B, D) seq-first (batch_first=False)."""
    F, B, D = lg_attention.shape
    x_rows = lg_attention.reshape(F * B, D)       # free row-major collapse, (f, b) order
    kernel = functools.partial(
        fused_forward_kernel,
        num_layers=packed["wqkv"].shape[0],
        num_head=num_head,
        head_dim=D // num_head,
        batch=B,
    )
    out = pl.pallas_call(
        kernel,
        out_shape=jax.ShapeDtypeStruct((B, 1), jnp.float32),
    )(x_rows, pe_rows,
      packed["wqkv"], packed["bqkv"], packed["wo"], packed["bo"],
      packed["ln1w"], packed["ln1b"], packed["w1"], packed["b1"],
      packed["w2"], packed["b2"], packed["ln2w"], packed["ln2b"],
      dec_w_tiled, dec_b, gmat)
    return out.reshape(-1)


# ---------------------------------------------------------------------------
# Parameter construction (PyTorch layout) + one-time host-side packing
# ---------------------------------------------------------------------------
def xavier_uniform(key, shape):
    fan_out, fan_in = shape
    a = math.sqrt(6.0 / (fan_in + fan_out))
    return jax.random.uniform(key, shape, jnp.float32, -a, a)


def make_params(key):
    """Parameters in PyTorch layout (W is (out, in)), mirroring the nn.Module."""
    params = []
    for _ in range(NUM_LAYERS):
        keys = jax.random.split(key, 5)
        key = keys[0]
        params.append(dict(
            wqkv=xavier_uniform(keys[1], (3 * D_MODEL, D_MODEL)),
            bqkv=jnp.zeros((1, 3 * D_MODEL), jnp.float32),
            wo=xavier_uniform(keys[2], (D_MODEL, D_MODEL)),
            bo=jnp.zeros((1, D_MODEL), jnp.float32),
            ln1w=jnp.ones((1, D_MODEL), jnp.float32),
            ln1b=jnp.zeros((1, D_MODEL), jnp.float32),
            w1=xavier_uniform(keys[3], (DIM_FF, D_MODEL)),
            b1=jnp.zeros((1, DIM_FF), jnp.float32),
            w2=xavier_uniform(keys[4], (D_MODEL, DIM_FF)),
            b2=jnp.zeros((1, D_MODEL), jnp.float32),
            ln2w=jnp.ones((1, D_MODEL), jnp.float32),
            ln2b=jnp.zeros((1, D_MODEL), jnp.float32),
        ))
    key, kd = jax.random.split(key)
    dec_w = xavier_uniform(kd, (1, D_MODEL * NUM_FRAMES))
    dec_b = jnp.zeros((1, 1), jnp.float32)
    return params, dec_w, dec_b


def pack_params(layer_params, dec_w, num_frames, batch):
    """One-time host prep: pre-transpose matrices (kernel does x @ W), stack over
    layers, tile the decoder weight per activation row, build the group-sum matrix."""
    stack = lambda name: jnp.stack([p[name] for p in layer_params], axis=0)
    stack_t = lambda name: jnp.stack([p[name].T for p in layer_params], axis=0)
    packed = dict(
        wqkv=stack_t("wqkv"), bqkv=stack("bqkv"),          # (L, D, 3D), (L, 1, 3D)
        wo=stack_t("wo"), bo=stack("bo"),                  # (L, D, D),  (L, 1, D)
        ln1w=stack("ln1w"), ln1b=stack("ln1b"),
        w1=stack_t("w1"), b1=stack("b1"),                  # (L, D, FF), (L, 1, FF)
        w2=stack_t("w2"), b2=stack("b2"),                  # (L, FF, D), (L, 1, D)
        ln2w=stack("ln2w"), ln2b=stack("ln2b"),
    )
    d_model = layer_params[0]["wo"].shape[0]
    # decoder weight for flat column j*D + d is dec_w_rows[j, d]; activation row i
    # (of the (F*B, D) slab) contributes with j = i % F  ->  tile over batch groups
    dec_w_rows = dec_w.reshape(num_frames, d_model)
    dec_w_tiled = jnp.tile(dec_w_rows, (batch, 1))                         # (F*B, D)
    # decoder (view) row r sums activation rows r*F .. r*F + F - 1
    rows = num_frames * batch
    r_ids = jnp.arange(batch)[:, None]
    i_ids = jnp.arange(rows)[None, :]
    gmat = ((i_ids // num_frames) == r_ids).astype(jnp.float32)            # (B, F*B)
    return packed, dec_w_tiled, gmat


def sinusoidal_pe_rows(num_frames, batch, d_model):
    pos = jnp.arange(num_frames, dtype=jnp.float32)[:, None]               # (F, 1)
    div = jnp.exp(jnp.arange(0, d_model, 2, dtype=jnp.float32)
                  * (-math.log(10000.0) / d_model))                        # (D/2,)
    pe = jnp.zeros((num_frames, d_model), jnp.float32)
    pe = pe.at[:, 0::2].set(jnp.sin(pos * div))
    pe = pe.at[:, 1::2].set(jnp.cos(pos * div))
    # folded activation rows are in (frame, batch) order -> repeat each frame B times
    return jnp.repeat(pe, batch, axis=0)                                   # (F*B, D)


# ---------------------------------------------------------------------------
if __name__ == "__main__":
    key = jax.random.PRNGKey(0)
    k_in, k_par = jax.random.split(key)

    lg_attention = jax.random.normal(k_in, (NUM_FRAMES, BATCH, D_MODEL), jnp.float32)
    layer_params, dec_w, dec_b = make_params(k_par)
    packed, dec_w_tiled, gmat = pack_params(layer_params, dec_w, NUM_FRAMES, BATCH)
    pe_rows = sinusoidal_pe_rows(NUM_FRAMES, BATCH, D_MODEL)

    fwd = jax.jit(functools.partial(frame_scoring_forward, num_head=NUM_HEAD))
    out = fwd(lg_attention, pe_rows, packed, dec_w_tiled, dec_b, gmat)
    out = jax.block_until_ready(out)

    assert out.shape == (BATCH,)
    assert bool(jnp.all(jnp.isfinite(out)))
    assert abs(float(jnp.sum(out)) - 1.0) < 1e-4   # softmax over the flattened logits
    print("KERNEL_OK")
</pallas_src>

<mosaic_0001>
module attributes {stable_mosaic.version = 11 : i64} {
  func.func @fused_forward_kernel(%arg0: memref<16x32xf32, #tpu.memory_space<vmem>>, %arg1: memref<16x32xf32, #tpu.memory_space<vmem>>, %arg2: memref<2x32x96xf32, #tpu.memory_space<vmem>>, %arg3: memref<2x1x96xf32, #tpu.memory_space<vmem>>, %arg4: memref<2x32x32xf32, #tpu.memory_space<vmem>>, %arg5: memref<2x1x32xf32, #tpu.memory_space<vmem>>, %arg6: memref<2x1x32xf32, #tpu.memory_space<vmem>>, %arg7: memref<2x1x32xf32, #tpu.memory_space<vmem>>, %arg8: memref<2x32x64xf32, #tpu.memory_space<vmem>>, %arg9: memref<2x1x64xf32, #tpu.memory_space<vmem>>, %arg10: memref<2x64x32xf32, #tpu.memory_space<vmem>>, %arg11: memref<2x1x32xf32, #tpu.memory_space<vmem>>, %arg12: memref<2x1x32xf32, #tpu.memory_space<vmem>>, %arg13: memref<2x1x32xf32, #tpu.memory_space<vmem>>, %arg14: memref<16x32xf32, #tpu.memory_space<vmem>>, %arg15: memref<1x1xf32, #tpu.memory_space<vmem>>, %arg16: memref<2x16xf32, #tpu.memory_space<vmem>>, %arg17: memref<2x1xf32, #tpu.memory_space<vmem>>) attributes {dimension_semantics = [], scalar_prefetch = 0 : i64, scratch_operands = 0 : i64, tpu.core_type = #tpu.core_type<tc>} {
    %c0 = arith.constant 0 : index
    %c0_0 = arith.constant 0 : index
    %0 = vector.load %arg0[%c0, %c0_0] : memref<16x32xf32, #tpu.memory_space<vmem>>, vector<16x32xf32>
    %c0_1 = arith.constant 0 : index
    %c0_2 = arith.constant 0 : index
    %1 = vector.load %arg1[%c0_1, %c0_2] : memref<16x32xf32, #tpu.memory_space<vmem>>, vector<16x32xf32>
    %2 = arith.addf %0, %1 : vector<16x32xf32>
    %3 = tpu.iota {dimensions = array<i32: 0>} : vector<16x16xi32>
    %c2_i32 = arith.constant 2 : i32
    %c0_i32 = arith.constant 0 : i32
    %4 = arith.cmpi eq, %c2_i32, %c0_i32 : i32
    %c1_i32 = arith.constant 1 : i32
    %5 = arith.select %4, %c1_i32, %c2_i32 : i32
    %6 = vector.broadcast %5 : i32 to vector<16x16xi32>
    %7 = arith.remsi %3, %6 : vector<16x16xi32>
    %c0_i32_3 = arith.constant 0 : i32
    %8 = vector.broadcast %c0_i32_3 : i32 to vector<16x16xi32>
    %9 = arith.cmpi ne, %7, %8 : vector<16x16xi32>
    %c0_i32_4 = arith.constant 0 : i32
    %10 = vector.broadcast %c0_i32_4 : i32 to vector<16x16xi32>
    %11 = arith.cmpi slt, %7, %10 : vector<16x16xi32>
    %c0_i32_5 = arith.constant 0 : i32
    %12 = arith.cmpi slt, %5, %c0_i32_5 : i32
    %13 = vector.broadcast %12 : i1 to vector<16x16xi1>
    %14 = vector.broadcast %13 : vector<16x16xi1> to vector<16x16xi1>
    %15 = arith.xori %11, %14 : vector<16x16xi1>
    %16 = arith.andi %15, %9 : vector<16x16xi1>
    %17 = vector.broadcast %5 : i32 to vector<16x16xi32>
    %18 = arith.addi %7, %17 : vector<16x16xi32>
    %19 = arith.select %16, %18, %7 : vector<16x16xi1>, vector<16x16xi32>
    %20 = tpu.iota {dimensions = array<i32: 1>} : vector<16x16xi32>
    %c2_i32_6 = arith.constant 2 : i32
    %c0_i32_7 = arith.constant 0 : i32
    %21 = arith.cmpi eq, %c2_i32_6, %c0_i32_7 : i32
    %c1_i32_8 = arith.constant 1 : i32
    %22 = arith.select %21, %c1_i32_8, %c2_i32_6 : i32
    %23 = vector.broadcast %22 : i32 to vector<16x16xi32>
    %24 = arith.remsi %20, %23 : vector<16x16xi32>
    %c0_i32_9 = arith.constant 0 : i32
    %25 = vector.broadcast %c0_i32_9 : i32 to vector<16x16xi32>
    %26 = arith.cmpi ne, %24, %25 : vector<16x16xi32>
    %c0_i32_10 = arith.constant 0 : i32
    %27 = vector.broadcast %c0_i32_10 : i32 to vector<16x16xi32>
    %28 = arith.cmpi slt, %24, %27 : vector<16x16xi32>
    %c0_i32_11 = arith.constant 0 : i32
    %29 = arith.cmpi slt, %22, %c0_i32_11 : i32
    %30 = vector.broadcast %29 : i1 to vector<16x16xi1>
    %31 = vector.broadcast %30 : vector<16x16xi1> to vector<16x16xi1>
    %32 = arith.xori %28, %31 : vector<16x16xi1>
    %33 = arith.andi %32, %26 : vector<16x16xi1>
    %34 = vector.broadcast %22 : i32 to vector<16x16xi32>
    %35 = arith.addi %24, %34 : vector<16x16xi32>
    %36 = arith.select %33, %35, %24 : vector<16x16xi1>, vector<16x16xi32>
    %37 = arith.cmpi eq, %19, %36 : vector<16x16xi32>
    %c0_12 = arith.constant 0 : index
    %c0_13 = arith.constant 0 : index
    %c0_14 = arith.constant 0 : index
    %38 = vector.load %arg2[%c0_12, %c0_13, %c0_14] : memref<2x32x96xf32, #tpu.memory_space<vmem>>, vector<1x32x96xf32>
    %39 = vector.shape_cast %38 : vector<1x32x96xf32> to vector<32x96xf32>
    %cst = arith.constant dense<0.000000e+00> : vector<16x96xf32>
    %40 = tpu.matmul %2, %39, %cst {dimension_numbers = #tpu.dot_dimension_numbers<[1], [0], [0], [1], [0, 0, 1, 1], [], []>} : vector<16x32xf32>, vector<32x96xf32>, vector<16x96xf32> -> vector<16x96xf32>
    %c0_15 = arith.constant 0 : index
    %c0_16 = arith.constant 0 : index
    %c0_17 = arith.constant 0 : index
    %41 = vector.load %arg3[%c0_15, %c0_16, %c0_17] : memref<2x1x96xf32, #tpu.memory_space<vmem>>, vector<1x1x96xf32>
    %42 = vector.shape_cast %41 : vector<1x1x96xf32> to vector<1x96xf32>
    %43 = vector.broadcast %42 : vector<1x96xf32> to vector<16x96xf32>
    %44 = arith.addf %40, %43 : vector<16x96xf32>
    %45 = vector.extract_strided_slice %44 {offsets = [0, 0], sizes = [16, 32], strides = [1, 1]} : vector<16x96xf32> to vector<16x32xf32>
    %cst_18 = arith.constant 0.353553385 : f32
    %46 = vector.broadcast %cst_18 : f32 to vector<16x32xf32>
    %47 = arith.mulf %45, %46 : vector<16x32xf32>
    %48 = vector.extract_strided_slice %44 {offsets = [0, 32], sizes = [16, 32], strides = [1, 1]} : vector<16x96xf32> to vector<16x32xf32>
    %49 = vector.extract_strided_slice %44 {offsets = [0, 64], sizes = [16, 32], strides = [1, 1]} : vector<16x96xf32> to vector<16x32xf32>
    %c0_19 = arith.constant 0 : index
    %c0_20 = arith.constant 0 : index
    %c0_21 = arith.constant 0 : index
    %50 = vector.load %arg4[%c0_19, %c0_20, %c0_21] : memref<2x32x32xf32, #tpu.memory_space<vmem>>, vector<1x32x32xf32>
    %51 = vector.shape_cast %50 : vector<1x32x32xf32> to vector<32x32xf32>
    %cst_22 = arith.constant 0.000000e+00 : f32
    %52 = vector.broadcast %cst_22 : f32 to vector<16x32xf32>
    %53 = vector.extract_strided_slice %47 {offsets = [0, 0], sizes = [16, 8], strides = [1, 1]} : vector<16x32xf32> to vector<16x8xf32>
    %54 = vector.extract_strided_slice %48 {offsets = [0, 0], sizes = [16, 8], strides = [1, 1]} : vector<16x32xf32> to vector<16x8xf32>
    %cst_23 = arith.constant dense<0.000000e+00> : vector<16x16xf32>
    %55 = tpu.matmul %53, %54, %cst_23 {dimension_numbers = #tpu.dot_dimension_numbers<[1], [1], [0], [0], [0, 0, 1, 0], [], []>} : vector<16x8xf32>, vector<16x8xf32>, vector<16x16xf32> -> vector<16x16xf32>
    %cst_24 = arith.constant -1.000000e+30 : f32
    %56 = vector.broadcast %cst_24 : f32 to vector<16x16xf32>
    %57 = arith.select %37, %55, %56 : vector<16x16xi1>, vector<16x16xf32>
    %cst_25 = arith.constant dense<0xFF800000> : vector<16xf32>
    %58 = vector.multi_reduction <maximumf>, %57, %cst_25 [1] : vector<16x16xf32> to vector<16xf32>
    %59 = vector.shape_cast %58 : vector<16xf32> to vector<16x1xf32>
    %60 = vector.broadcast %59 : vector<16x1xf32> to vector<16x16xf32>
    %61 = arith.subf %57, %60 : vector<16x16xf32>
    %62 = math.exp %61 : vector<16x16xf32>
    %cst_26 = arith.constant dense<0.000000e+00> : vector<16xf32>
    %63 = vector.multi_reduction <add>, %62, %cst_26 [1] : vector<16x16xf32> to vector<16xf32>
    %64 = vector.shape_cast %63 : vector<16xf32> to vector<16x1xf32>
    %65 = tpu.reciprocal %64 {approx = true} : vector<16x1xf32> -> vector<16x1xf32>
    %66 = vector.broadcast %65 : vector<16x1xf32> to vector<16x16xf32>
    %67 = arith.mulf %62, %66 : vector<16x16xf32>
    %68 = vector.extract_strided_slice %49 {offsets = [0, 0], sizes = [16, 8], strides = [1, 1]} : vector<16x32xf32> to vector<16x8xf32>
    %cst_27 = arith.constant dense<0.000000e+00> : vector<16x8xf32>
    %69 = tpu.matmul %67, %68, %cst_27 {dimension_numbers = #tpu.dot_dimension_numbers<[1], [0], [0], [1], [0, 0, 1, 1], [], []>} : vector<16x16xf32>, vector<16x8xf32>, vector<16x8xf32> -> vector<16x8xf32>
    %70 = vector.extract_strided_slice %51 {offsets = [0, 0], sizes = [8, 32], strides = [1, 1]} : vector<32x32xf32> to vector<8x32xf32>
    %cst_28 = arith.constant dense<0.000000e+00> : vector<16x32xf32>
    %71 = tpu.matmul %69, %70, %cst_28 {dimension_numbers = #tpu.dot_dimension_numbers<[1], [0], [0], [1], [0, 0, 1, 1], [], []>} : vector<16x8xf32>, vector<8x32xf32>, vector<16x32xf32> -> vector<16x32xf32>
    %72 = arith.addf %52, %71 : vector<16x32xf32>
    %73 = vector.extract_strided_slice %47 {offsets = [0, 8], sizes = [16, 8], strides = [1, 1]} : vector<16x32xf32> to vector<16x8xf32>
    %74 = vector.extract_strided_slice %48 {offsets = [0, 8], sizes = [16, 8], strides = [1, 1]} : vector<16x32xf32> to vector<16x8xf32>
    %cst_29 = arith.constant dense<0.000000e+00> : vector<16x16xf32>
    %75 = tpu.matmul %73, %74, %cst_29 {dimension_numbers = #tpu.dot_dimension_numbers<[1], [1], [0], [0], [0, 0, 1, 0], [], []>} : vector<16x8xf32>, vector<16x8xf32>, vector<16x16xf32> -> vector<16x16xf32>
    %cst_30 = arith.constant -1.000000e+30 : f32
    %76 = vector.broadcast %cst_30 : f32 to vector<16x16xf32>
    %77 = arith.select %37, %75, %76 : vector<16x16xi1>, vector<16x16xf32>
    %cst_31 = arith.constant dense<0xFF800000> : vector<16xf32>
    %78 = vector.multi_reduction <maximumf>, %77, %cst_31 [1] : vector<16x16xf32> to vector<16xf32>
    %79 = vector.shape_cast %78 : vector<16xf32> to vector<16x1xf32>
    %80 = vector.broadcast %79 : vector<16x1xf32> to vector<16x16xf32>
    %81 = arith.subf %77, %80 : vector<16x16xf32>
    %82 = math.exp %81 : vector<16x16xf32>
    %cst_32 = arith.constant dense<0.000000e+00> : vector<16xf32>
    %83 = vector.multi_reduction <add>, %82, %cst_32 [1] : vector<16x16xf32> to vector<16xf32>
    %84 = vector.shape_cast %83 : vector<16xf32> to vector<16x1xf32>
    %85 = tpu.reciprocal %84 {approx = true} : vector<16x1xf32> -> vector<16x1xf32>
    %86 = vector.broadcast %85 : vector<16x1xf32> to vector<16x16xf32>
    %87 = arith.mulf %82, %86 : vector<16x16xf32>
    %88 = vector.extract_strided_slice %49 {offsets = [0, 8], sizes = [16, 8], strides = [1, 1]} : vector<16x32xf32> to vector<16x8xf32>
    %cst_33 = arith.constant dense<0.000000e+00> : vector<16x8xf32>
    %89 = tpu.matmul %87, %88, %cst_33 {dimension_numbers = #tpu.dot_dimension_numbers<[1], [0], [0], [1], [0, 0, 1, 1], [], []>} : vector<16x16xf32>, vector<16x8xf32>, vector<16x8xf32> -> vector<16x8xf32>
    %90 = vector.extract_strided_slice %51 {offsets = [8, 0], sizes = [8, 32], strides = [1, 1]} : vector<32x32xf32> to vector<8x32xf32>
    %cst_34 = arith.constant dense<0.000000e+00> : vector<16x32xf32>
    %91 = tpu.matmul %89, %90, %cst_34 {dimension_numbers = #tpu.dot_dimension_numbers<[1], [0], [0], [1], [0, 0, 1, 1], [], []>} : vector<16x8xf32>, vector<8x32xf32>, vector<16x32xf32> -> vector<16x32xf32>
    %92 = arith.addf %72, %91 : vector<16x32xf32>
    %93 = vector.extract_strided_slice %47 {offsets = [0, 16], sizes = [16, 8], strides = [1, 1]} : vector<16x32xf32> to vector<16x8xf32>
    %94 = vector.extract_strided_slice %48 {offsets = [0, 16], sizes = [16, 8], strides = [1, 1]} : vector<16x32xf32> to vector<16x8xf32>
    %cst_35 = arith.constant dense<0.000000e+00> : vector<16x16xf32>
    %95 = tpu.matmul %93, %94, %cst_35 {dimension_numbers = #tpu.dot_dimension_numbers<[1], [1], [0], [0], [0, 0, 1, 0], [], []>} : vector<16x8xf32>, vector<16x8xf32>, vector<16x16xf32> -> vector<16x16xf32>
    %cst_36 = arith.constant -1.000000e+30 : f32
    %96 = vector.broadcast %cst_36 : f32 to vector<16x16xf32>
    %97 = arith.select %37, %95, %96 : vector<16x16xi1>, vector<16x16xf32>
    %cst_37 = arith.constant dense<0xFF800000> : vector<16xf32>
    %98 = vector.multi_reduction <maximumf>, %97, %cst_37 [1] : vector<16x16xf32> to vector<16xf32>
    %99 = vector.shape_cast %98 : vector<16xf32> to vector<16x1xf32>
    %100 = vector.broadcast %99 : vector<16x1xf32> to vector<16x16xf32>
    %101 = arith.subf %97, %100 : vector<16x16xf32>
    %102 = math.exp %101 : vector<16x16xf32>
    %cst_38 = arith.constant dense<0.000000e+00> : vector<16xf32>
    %103 = vector.multi_reduction <add>, %102, %cst_38 [1] : vector<16x16xf32> to vector<16xf32>
    %104 = vector.shape_cast %103 : vector<16xf32> to vector<16x1xf32>
    %105 = tpu.reciprocal %104 {approx = true} : vector<16x1xf32> -> vector<16x1xf32>
    %106 = vector.broadcast %105 : vector<16x1xf32> to vector<16x16xf32>
    %107 = arith.mulf %102, %106 : vector<16x16xf32>
    %108 = vector.extract_strided_slice %49 {offsets = [0, 16], sizes = [16, 8], strides = [1, 1]} : vector<16x32xf32> to vector<16x8xf32>
    %cst_39 = arith.constant dense<0.000000e+00> : vector<16x8xf32>
    %109 = tpu.matmul %107, %108, %cst_39 {dimension_numbers = #tpu.dot_dimension_numbers<[1], [0], [0], [1], [0, 0, 1, 1], [], []>} : vector<16x16xf32>, vector<16x8xf32>, vector<16x8xf32> -> vector<16x8xf32>
    %110 = vector.extract_strided_slice %51 {offsets = [16, 0], sizes = [8, 32], strides = [1, 1]} : vector<32x32xf32> to vector<8x32xf32>
    %cst_40 = arith.constant dense<0.000000e+00> : vector<16x32xf32>
    %111 = tpu.matmul %109, %110, %cst_40 {dimension_numbers = #tpu.dot_dimension_numbers<[1], [0], [0], [1], [0, 0, 1, 1], [], []>} : vector<16x8xf32>, vector<8x32xf32>, vector<16x32xf32> -> vector<16x32xf32>
    %112 = arith.addf %92, %111 : vector<16x32xf32>
    %113 = vector.extract_strided_slice %47 {offsets = [0, 24], sizes = [16, 8], strides = [1, 1]} : vector<16x32xf32> to vector<16x8xf32>
    %114 = vector.extract_strided_slice %48 {offsets = [0, 24], sizes = [16, 8], strides = [1, 1]} : vector<16x32xf32> to vector<16x8xf32>
    %cst_41 = arith.constant dense<0.000000e+00> : vector<16x16xf32>
    %115 = tpu.matmul %113, %114, %cst_41 {dimension_numbers = #tpu.dot_dimension_numbers<[1], [1], [0], [0], [0, 0, 1, 0], [], []>} : vector<16x8xf32>, vector<16x8xf32>, vector<16x16xf32> -> vector<16x16xf32>
    %cst_42 = arith.constant -1.000000e+30 : f32
    %116 = vector.broadcast %cst_42 : f32 to vector<16x16xf32>
    %117 = arith.select %37, %115, %116 : vector<16x16xi1>, vector<16x16xf32>
    %cst_43 = arith.constant dense<0xFF800000> : vector<16xf32>
    %118 = vector.multi_reduction <maximumf>, %117, %cst_43 [1] : vector<16x16xf32> to vector<16xf32>
    %119 = vector.shape_cast %118 : vector<16xf32> to vector<16x1xf32>
    %120 = vector.broadcast %119 : vector<16x1xf32> to vector<16x16xf32>
    %121 = arith.subf %117, %120 : vector<16x16xf32>
    %122 = math.exp %121 : vector<16x16xf32>
    %cst_44 = arith.constant dense<0.000000e+00> : vector<16xf32>
    %123 = vector.multi_reduction <add>, %122, %cst_44 [1] : vector<16x16xf32> to vector<16xf32>
    %124 = vector.shape_cast %123 : vector<16xf32> to vector<16x1xf32>
    %125 = tpu.reciprocal %124 {approx = true} : vector<16x1xf32> -> vector<16x1xf32>
    %126 = vector.broadcast %125 : vector<16x1xf32> to vector<16x16xf32>
    %127 = arith.mulf %122, %126 : vector<16x16xf32>
    %128 = vector.extract_strided_slice %49 {offsets = [0, 24], sizes = [16, 8], strides = [1, 1]} : vector<16x32xf32> to vector<16x8xf32>
    %cst_45 = arith.constant dense<0.000000e+00> : vector<16x8xf32>
    %129 = tpu.matmul %127, %128, %cst_45 {dimension_numbers = #tpu.dot_dimension_numbers<[1], [0], [0], [1], [0, 0, 1, 1], [], []>} : vector<16x16xf32>, vector<16x8xf32>, vector<16x8xf32> -> vector<16x8xf32>
    %130 = vector.extract_strided_slice %51 {offsets = [24, 0], sizes = [8, 32], strides = [1, 1]} : vector<32x32xf32> to vector<8x32xf32>
    %cst_46 = arith.constant dense<0.000000e+00> : vector<16x32xf32>
    %131 = tpu.matmul %129, %130, %cst_46 {dimension_numbers = #tpu.dot_dimension_numbers<[1], [0], [0], [1], [0, 0, 1, 1], [], []>} : vector<16x8xf32>, vector<8x32xf32>, vector<16x32xf32> -> vector<16x32xf32>
    %132 = arith.addf %112, %131 : vector<16x32xf32>
    %c0_47 = arith.constant 0 : index
    %c0_48 = arith.constant 0 : index
    %c0_49 = arith.constant 0 : index
    %133 = vector.load %arg5[%c0_47, %c0_48, %c0_49] : memref<2x1x32xf32, #tpu.memory_space<vmem>>, vector<1x1x32xf32>
    %134 = vector.shape_cast %133 : vector<1x1x32xf32> to vector<1x32xf32>
    %135 = vector.broadcast %134 : vector<1x32xf32> to vector<16x32xf32>
    %136 = arith.addf %132, %135 : vector<16x32xf32>
    %137 = arith.addf %2, %136 : vector<16x32xf32>
    %cst_50 = arith.constant dense<0.000000e+00> : vector<16xf32>
    %138 = vector.multi_reduction <add>, %137, %cst_50 [1] : vector<16x32xf32> to vector<16xf32>
    %139 = vector.shape_cast %138 : vector<16xf32> to vector<16x1xf32>
    %cst_51 = arith.constant 3.200000e+01 : f32
    %140 = vector.broadcast %cst_51 : f32 to vector<16x1xf32>
    %141 = arith.divf %139, %140 : vector<16x1xf32>
    %142 = vector.broadcast %141 : vector<16x1xf32> to vector<16x32xf32>
    %143 = arith.subf %137, %142 : vector<16x32xf32>
    %144 = arith.mulf %143, %143 : vector<16x32xf32>
    %cst_52 = arith.constant dense<0.000000e+00> : vector<16xf32>
    %145 = vector.multi_reduction <add>, %144, %cst_52 [1] : vector<16x32xf32> to vector<16xf32>
    %146 = vector.shape_cast %145 : vector<16xf32> to vector<16x1xf32>
    %cst_53 = arith.constant 3.200000e+01 : f32
    %147 = vector.broadcast %cst_53 : f32 to vector<16x1xf32>
    %148 = arith.divf %146, %147 : vector<16x1xf32>
    %149 = vector.broadcast %141 : vector<16x1xf32> to vector<16x32xf32>
    %150 = arith.subf %137, %149 : vector<16x32xf32>
    %cst_54 = arith.constant 9.99999974E-6 : f32
    %151 = vector.broadcast %cst_54 : f32 to vector<16x1xf32>
    %152 = arith.addf %148, %151 : vector<16x1xf32>
    %153 = math.rsqrt %152 : vector<16x1xf32>
    %154 = vector.broadcast %153 : vector<16x1xf32> to vector<16x32xf32>
    %155 = arith.mulf %150, %154 : vector<16x32xf32>
    %c0_55 = arith.constant 0 : index
    %c0_56 = arith.constant 0 : index
    %c0_57 = arith.constant 0 : index
    %156 = vector.load %arg6[%c0_55, %c0_56, %c0_57] : memref<2x1x32xf32, #tpu.memory_space<vmem>>, vector<1x1x32xf32>
    %157 = vector.shape_cast %156 : vector<1x1x32xf32> to vector<1x32xf32>
    %158 = vector.broadcast %157 : vector<1x32xf32> to vector<16x32xf32>
    %159 = arith.mulf %155, %158 : vector<16x32xf32>
    %c0_58 = arith.constant 0 : index
    %c0_59 = arith.constant 0 : index
    %c0_60 = arith.constant 0 : index
    %160 = vector.load %arg7[%c0_58, %c0_59, %c0_60] : memref<2x1x32xf32, #tpu.memory_space<vmem>>, vector<1x1x32xf32>
    %161 = vector.shape_cast %160 : vector<1x1x32xf32> to vector<1x32xf32>
    %162 = vector.broadcast %161 : vector<1x32xf32> to vector<16x32xf32>
    %163 = arith.addf %159, %162 : vector<16x32xf32>
    %c0_61 = arith.constant 0 : index
    %c0_62 = arith.constant 0 : index
    %c0_63 = arith.constant 0 : index
    %164 = vector.load %arg8[%c0_61, %c0_62, %c0_63] : memref<2x32x64xf32, #tpu.memory_space<vmem>>, vector<1x32x64xf32>
    %165 = vector.shape_cast %164 : vector<1x32x64xf32> to vector<32x64xf32>
    %cst_64 = arith.constant dense<0.000000e+00> : vector<16x64xf32>
    %166 = tpu.matmul %163, %165, %cst_64 {dimension_numbers = #tpu.dot_dimension_numbers<[1], [0], [0], [1], [0, 0, 1, 1], [], []>} : vector<16x32xf32>, vector<32x64xf32>, vector<16x64xf32> -> vector<16x64xf32>
    %c0_65 = arith.constant 0 : index
    %c0_66 = arith.constant 0 : index
    %c0_67 = arith.constant 0 : index
    %167 = vector.load %arg9[%c0_65, %c0_66, %c0_67] : memref<2x1x64xf32, #tpu.memory_space<vmem>>, vector<1x1x64xf32>
    %168 = vector.shape_cast %167 : vector<1x1x64xf32> to vector<1x64xf32>
    %169 = vector.broadcast %168 : vector<1x64xf32> to vector<16x64xf32>
    %170 = arith.addf %166, %169 : vector<16x64xf32>
    %cst_68 = arith.constant 0.000000e+00 : f32
    %171 = vector.broadcast %cst_68 : f32 to vector<16x64xf32>
    %172 = arith.maximumf %170, %171 : vector<16x64xf32>
    %c0_69 = arith.constant 0 : index
    %c0_70 = arith.constant 0 : index
    %c0_71 = arith.constant 0 : index
    %173 = vector.load %arg10[%c0_69, %c0_70, %c0_71] : memref<2x64x32xf32, #tpu.memory_space<vmem>>, vector<1x64x32xf32>
    %174 = vector.shape_cast %173 : vector<1x64x32xf32> to vector<64x32xf32>
    %cst_72 = arith.constant dense<0.000000e+00> : vector<16x32xf32>
    %175 = tpu.matmul %172, %174, %cst_72 {dimension_numbers = #tpu.dot_dimension_numbers<[1], [0], [0], [1], [0, 0, 1, 1], [], []>} : vector<16x64xf32>, vector<64x32xf32>, vector<16x32xf32> -> vector<16x32xf32>
    %c0_73 = arith.constant 0 : index
    %c0_74 = arith.constant 0 : index
    %c0_75 = arith.constant 0 : index
    %176 = vector.load %arg11[%c0_73, %c0_74, %c0_75] : memref<2x1x32xf32, #tpu.memory_space<vmem>>, vector<1x1x32xf32>
    %177 = vector.shape_cast %176 : vector<1x1x32xf32> to vector<1x32xf32>
    %178 = vector.broadcast %177 : vector<1x32xf32> to vector<16x32xf32>
    %179 = arith.addf %175, %178 : vector<16x32xf32>
    %180 = arith.addf %163, %179 : vector<16x32xf32>
    %cst_76 = arith.constant dense<0.000000e+00> : vector<16xf32>
    %181 = vector.multi_reduction <add>, %180, %cst_76 [1] : vector<16x32xf32> to vector<16xf32>
    %182 = vector.shape_cast %181 : vector<16xf32> to vector<16x1xf32>
    %cst_77 = arith.constant 3.200000e+01 : f32
    %183 = vector.broadcast %cst_77 : f32 to vector<16x1xf32>
    %184 = arith.divf %182, %183 : vector<16x1xf32>
    %185 = vector.broadcast %184 : vector<16x1xf32> to vector<16x32xf32>
    %186 = arith.subf %180, %185 : vector<16x32xf32>
    %187 = arith.mulf %186, %186 : vector<16x32xf32>
    %cst_78 = arith.constant dense<0.000000e+00> : vector<16xf32>
    %188 = vector.multi_reduction <add>, %187, %cst_78 [1] : vector<16x32xf32> to vector<16xf32>
    %189 = vector.shape_cast %188 : vector<16xf32> to vector<16x1xf32>
    %cst_79 = arith.constant 3.200000e+01 : f32
    %190 = vector.broadcast %cst_79 : f32 to vector<16x1xf32>
    %191 = arith.divf %189, %190 : vector<16x1xf32>
    %192 = vector.broadcast %184 : vector<16x1xf32> to vector<16x32xf32>
    %193 = arith.subf %180, %192 : vector<16x32xf32>
    %cst_80 = arith.constant 9.99999974E-6 : f32
    %194 = vector.broadcast %cst_80 : f32 to vector<16x1xf32>
    %195 = arith.addf %191, %194 : vector<16x1xf32>
    %196 = math.rsqrt %195 : vector<16x1xf32>
    %197 = vector.broadcast %196 : vector<16x1xf32> to vector<16x32xf32>
    %198 = arith.mulf %193, %197 : vector<16x32xf32>
    %c0_81 = arith.constant 0 : index
    %c0_82 = arith.constant 0 : index
    %c0_83 = arith.constant 0 : index
    %199 = vector.load %arg12[%c0_81, %c0_82, %c0_83] : memref<2x1x32xf32, #tpu.memory_space<vmem>>, vector<1x1x32xf32>
    %200 = vector.shape_cast %199 : vector<1x1x32xf32> to vector<1x32xf32>
    %201 = vector.broadcast %200 : vector<1x32xf32> to vector<16x32xf32>
    %202 = arith.mulf %198, %201 : vector<16x32xf32>
    %c0_84 = arith.constant 0 : index
    %c0_85 = arith.constant 0 : index
    %c0_86 = arith.constant 0 : index
    %203 = vector.load %arg13[%c0_84, %c0_85, %c0_86] : memref<2x1x32xf32, #tpu.memory_space<vmem>>, vector<1x1x32xf32>
    %204 = vector.shape_cast %203 : vector<1x1x32xf32> to vector<1x32xf32>
    %205 = vector.broadcast %204 : vector<1x32xf32> to vector<16x32xf32>
    %206 = arith.addf %202, %205 : vector<16x32xf32>
    %c1 = arith.constant 1 : index
    %c0_87 = arith.constant 0 : index
    %c0_88 = arith.constant 0 : index
    %207 = vector.load %arg2[%c1, %c0_87, %c0_88] : memref<2x32x96xf32, #tpu.memory_space<vmem>>, vector<1x32x96xf32>
    %208 = vector.shape_cast %207 : vector<1x32x96xf32> to vector<32x96xf32>
    %cst_89 = arith.constant dense<0.000000e+00> : vector<16x96xf32>
    %209 = tpu.matmul %206, %208, %cst_89 {dimension_numbers = #tpu.dot_dimension_numbers<[1], [0], [0], [1], [0, 0, 1, 1], [], []>} : vector<16x32xf32>, vector<32x96xf32>, vector<16x96xf32> -> vector<16x96xf32>
    %c1_90 = arith.constant 1 : index
    %c0_91 = arith.constant 0 : index
    %c0_92 = arith.constant 0 : index
    %210 = vector.load %arg3[%c1_90, %c0_91, %c0_92] : memref<2x1x96xf32, #tpu.memory_space<vmem>>, vector<1x1x96xf32>
    %211 = vector.shape_cast %210 : vector<1x1x96xf32> to vector<1x96xf32>
    %212 = vector.broadcast %211 : vector<1x96xf32> to vector<16x96xf32>
    %213 = arith.addf %209, %212 : vector<16x96xf32>
    %214 = vector.extract_strided_slice %213 {offsets = [0, 0], sizes = [16, 32], strides = [1, 1]} : vector<16x96xf32> to vector<16x32xf32>
    %cst_93 = arith.constant 0.353553385 : f32
    %215 = vector.broadcast %cst_93 : f32 to vector<16x32xf32>
    %216 = arith.mulf %214, %215 : vector<16x32xf32>
    %217 = vector.extract_strided_slice %213 {offsets = [0, 32], sizes = [16, 32], strides = [1, 1]} : vector<16x96xf32> to vector<16x32xf32>
    %218 = vector.extract_strided_slice %213 {offsets = [0, 64], sizes = [16, 32], strides = [1, 1]} : vector<16x96xf32> to vector<16x32xf32>
    %c1_94 = arith.constant 1 : index
    %c0_95 = arith.constant 0 : index
    %c0_96 = arith.constant 0 : index
    %219 = vector.load %arg4[%c1_94, %c0_95, %c0_96] : memref<2x32x32xf32, #tpu.memory_space<vmem>>, vector<1x32x32xf32>
    %220 = vector.shape_cast %219 : vector<1x32x32xf32> to vector<32x32xf32>
    %cst_97 = arith.constant 0.000000e+00 : f32
    %221 = vector.broadcast %cst_97 : f32 to vector<16x32xf32>
    %222 = vector.extract_strided_slice %216 {offsets = [0, 0], sizes = [16, 8], strides = [1, 1]} : vector<16x32xf32> to vector<16x8xf32>
    %223 = vector.extract_strided_slice %217 {offsets = [0, 0], sizes = [16, 8], strides = [1, 1]} : vector<16x32xf32> to vector<16x8xf32>
    %cst_98 = arith.constant dense<0.000000e+00> : vector<16x16xf32>
    %224 = tpu.matmul %222, %223, %cst_98 {dimension_numbers = #tpu.dot_dimension_numbers<[1], [1], [0], [0], [0, 0, 1, 0], [], []>} : vector<16x8xf32>, vector<16x8xf32>, vector<16x16xf32> -> vector<16x16xf32>
    %cst_99 = arith.constant -1.000000e+30 : f32
    %225 = vector.broadcast %cst_99 : f32 to vector<16x16xf32>
    %226 = arith.select %37, %224, %225 : vector<16x16xi1>, vector<16x16xf32>
    %cst_100 = arith.constant dense<0xFF800000> : vector<16xf32>
    %227 = vector.multi_reduction <maximumf>, %226, %cst_100 [1] : vector<16x16xf32> to vector<16xf32>
    %228 = vector.shape_cast %227 : vector<16xf32> to vector<16x1xf32>
    %229 = vector.broadcast %228 : vector<16x1xf32> to vector<16x16xf32>
    %230 = arith.subf %226, %229 : vector<16x16xf32>
    %231 = math.exp %230 : vector<16x16xf32>
    %cst_101 = arith.constant dense<0.000000e+00> : vector<16xf32>
    %232 = vector.multi_reduction <add>, %231, %cst_101 [1] : vector<16x16xf32> to vector<16xf32>
    %233 = vector.shape_cast %232 : vector<16xf32> to vector<16x1xf32>
    %234 = tpu.reciprocal %233 {approx = true} : vector<16x1xf32> -> vector<16x1xf32>
    %235 = vector.broadcast %234 : vector<16x1xf32> to vector<16x16xf32>
    %236 = arith.mulf %231, %235 : vector<16x16xf32>
    %237 = vector.extract_strided_slice %218 {offsets = [0, 0], sizes = [16, 8], strides = [1, 1]} : vector<16x32xf32> to vector<16x8xf32>
    %cst_102 = arith.constant dense<0.000000e+00> : vector<16x8xf32>
    %238 = tpu.matmul %236, %237, %cst_102 {dimension_numbers = #tpu.dot_dimension_numbers<[1], [0], [0], [1], [0, 0, 1, 1], [], []>} : vector<16x16xf32>, vector<16x8xf32>, vector<16x8xf32> -> vector<16x8xf32>
    %239 = vector.extract_strided_slice %220 {offsets = [0, 0], sizes = [8, 32], strides = [1, 1]} : vector<32x32xf32> to vector<8x32xf32>
    %cst_103 = arith.constant dense<0.000000e+00> : vector<16x32xf32>
    %240 = tpu.matmul %238, %239, %cst_103 {dimension_numbers = #tpu.dot_dimension_numbers<[1], [0], [0], [1], [0, 0, 1, 1], [], []>} : vector<16x8xf32>, vector<8x32xf32>, vector<16x32xf32> -> vector<16x32xf32>
    %241 = arith.addf %221, %240 : vector<16x32xf32>
    %242 = vector.extract_strided_slice %216 {offsets = [0, 8], sizes = [16, 8], strides = [1, 1]} : vector<16x32xf32> to vector<16x8xf32>
    %243 = vector.extract_strided_slice %217 {offsets = [0, 8], sizes = [16, 8], strides = [1, 1]} : vector<16x32xf32> to vector<16x8xf32>
    %cst_104 = arith.constant dense<0.000000e+00> : vector<16x16xf32>
    %244 = tpu.matmul %242, %243, %cst_104 {dimension_numbers = #tpu.dot_dimension_numbers<[1], [1], [0], [0], [0, 0, 1, 0], [], []>} : vector<16x8xf32>, vector<16x8xf32>, vector<16x16xf32> -> vector<16x16xf32>
    %cst_105 = arith.constant -1.000000e+30 : f32
    %245 = vector.broadcast %cst_105 : f32 to vector<16x16xf32>
    %246 = arith.select %37, %244, %245 : vector<16x16xi1>, vector<16x16xf32>
    %cst_106 = arith.constant dense<0xFF800000> : vector<16xf32>
    %247 = vector.multi_reduction <maximumf>, %246, %cst_106 [1] : vector<16x16xf32> to vector<16xf32>
    %248 = vector.shape_cast %247 : vector<16xf32> to vector<16x1xf32>
    %249 = vector.broadcast %248 : vector<16x1xf32> to vector<16x16xf32>
    %250 = arith.subf %246, %249 : vector<16x16xf32>
    %251 = math.exp %250 : vector<16x16xf32>
    %cst_107 = arith.constant dense<0.000000e+00> : vector<16xf32>
    %252 = vector.multi_reduction <add>, %251, %cst_107 [1] : vector<16x16xf32> to vector<16xf32>
    %253 = vector.shape_cast %252 : vector<16xf32> to vector<16x1xf32>
    %254 = tpu.reciprocal %253 {approx = true} : vector<16x1xf32> -> vector<16x1xf32>
    %255 = vector.broadcast %254 : vector<16x1xf32> to vector<16x16xf32>
    %256 = arith.mulf %251, %255 : vector<16x16xf32>
    %257 = vector.extract_strided_slice %218 {offsets = [0, 8], sizes = [16, 8], strides = [1, 1]} : vector<16x32xf32> to vector<16x8xf32>
    %cst_108 = arith.constant dense<0.000000e+00> : vector<16x8xf32>
    %258 = tpu.matmul %256, %257, %cst_108 {dimension_numbers = #tpu.dot_dimension_numbers<[1], [0], [0], [1], [0, 0, 1, 1], [], []>} : vector<16x16xf32>, vector<16x8xf32>, vector<16x8xf32> -> vector<16x8xf32>
    %259 = vector.extract_strided_slice %220 {offsets = [8, 0], sizes = [8, 32], strides = [1, 1]} : vector<32x32xf32> to vector<8x32xf32>
    %cst_109 = arith.constant dense<0.000000e+00> : vector<16x32xf32>
    %260 = tpu.matmul %258, %259, %cst_109 {dimension_numbers = #tpu.dot_dimension_numbers<[1], [0], [0], [1], [0, 0, 1, 1], [], []>} : vector<16x8xf32>, vector<8x32xf32>, vector<16x32xf32> -> vector<16x32xf32>
    %261 = arith.addf %241, %260 : vector<16x32xf32>
    %262 = vector.extract_strided_slice %216 {offsets = [0, 16], sizes = [16, 8], strides = [1, 1]} : vector<16x32xf32> to vector<16x8xf32>
    %263 = vector.extract_strided_slice %217 {offsets = [0, 16], sizes = [16, 8], strides = [1, 1]} : vector<16x32xf32> to vector<16x8xf32>
    %cst_110 = arith.constant dense<0.000000e+00> : vector<16x16xf32>
    %264 = tpu.matmul %262, %263, %cst_110 {dimension_numbers = #tpu.dot_dimension_numbers<[1], [1], [0], [0], [0, 0, 1, 0], [], []>} : vector<16x8xf32>, vector<16x8xf32>, vector<16x16xf32> -> vector<16x16xf32>
    %cst_111 = arith.constant -1.000000e+30 : f32
    %265 = vector.broadcast %cst_111 : f32 to vector<16x16xf32>
    %266 = arith.select %37, %264, %265 : vector<16x16xi1>, vector<16x16xf32>
    %cst_112 = arith.constant dense<0xFF800000> : vector<16xf32>
    %267 = vector.multi_reduction <maximumf>, %266, %cst_112 [1] : vector<16x16xf32> to vector<16xf32>
    %268 = vector.shape_cast %267 : vector<16xf32> to vector<16x1xf32>
    %269 = vector.broadcast %268 : vector<16x1xf32> to vector<16x16xf32>
    %270 = arith.subf %266, %269 : vector<16x16xf32>
    %271 = math.exp %270 : vector<16x16xf32>
    %cst_113 = arith.constant dense<0.000000e+00> : vector<16xf32>
    %272 = vector.multi_reduction <add>, %271, %cst_113 [1] : vector<16x16xf32> to vector<16xf32>
    %273 = vector.shape_cast %272 : vector<16xf32> to vector<16x1xf32>
    %274 = tpu.reciprocal %273 {approx = true} : vector<16x1xf32> -> vector<16x1xf32>
    %275 = vector.broadcast %274 : vector<16x1xf32> to vector<16x16xf32>
    %276 = arith.mulf %271, %275 : vector<16x16xf32>
    %277 = vector.extract_strided_slice %218 {offsets = [0, 16], sizes = [16, 8], strides = [1, 1]} : vector<16x32xf32> to vector<16x8xf32>
    %cst_114 = arith.constant dense<0.000000e+00> : vector<16x8xf32>
    %278 = tpu.matmul %276, %277, %cst_114 {dimension_numbers = #tpu.dot_dimension_numbers<[1], [0], [0], [1], [0, 0, 1, 1], [], []>} : vector<16x16xf32>, vector<16x8xf32>, vector<16x8xf32> -> vector<16x8xf32>
    %279 = vector.extract_strided_slice %220 {offsets = [16, 0], sizes = [8, 32], strides = [1, 1]} : vector<32x32xf32> to vector<8x32xf32>
    %cst_115 = arith.constant dense<0.000000e+00> : vector<16x32xf32>
    %280 = tpu.matmul %278, %279, %cst_115 {dimension_numbers = #tpu.dot_dimension_numbers<[1], [0], [0], [1], [0, 0, 1, 1], [], []>} : vector<16x8xf32>, vector<8x32xf32>, vector<16x32xf32> -> vector<16x32xf32>
    %281 = arith.addf %261, %280 : vector<16x32xf32>
    %282 = vector.extract_strided_slice %216 {offsets = [0, 24], sizes = [16, 8], strides = [1, 1]} : vector<16x32xf32> to vector<16x8xf32>
    %283 = vector.extract_strided_slice %217 {offsets = [0, 24], sizes = [16, 8], strides = [1, 1]} : vector<16x32xf32> to vector<16x8xf32>
    %cst_116 = arith.constant dense<0.000000e+00> : vector<16x16xf32>
    %284 = tpu.matmul %282, %283, %cst_116 {dimension_numbers = #tpu.dot_dimension_numbers<[1], [1], [0], [0], [0, 0, 1, 0], [], []>} : vector<16x8xf32>, vector<16x8xf32>, vector<16x16xf32> -> vector<16x16xf32>
    %cst_117 = arith.constant -1.000000e+30 : f32
    %285 = vector.broadcast %cst_117 : f32 to vector<16x16xf32>
    %286 = arith.select %37, %284, %285 : vector<16x16xi1>, vector<16x16xf32>
    %cst_118 = arith.constant dense<0xFF800000> : vector<16xf32>
    %287 = vector.multi_reduction <maximumf>, %286, %cst_118 [1] : vector<16x16xf32> to vector<16xf32>
    %288 = vector.shape_cast %287 : vector<16xf32> to vector<16x1xf32>
    %289 = vector.broadcast %288 : vector<16x1xf32> to vector<16x16xf32>
    %290 = arith.subf %286, %289 : vector<16x16xf32>
    %291 = math.exp %290 : vector<16x16xf32>
    %cst_119 = arith.constant dense<0.000000e+00> : vector<16xf32>
    %292 = vector.multi_reduction <add>, %291, %cst_119 [1] : vector<16x16xf32> to vector<16xf32>
    %293 = vector.shape_cast %292 : vector<16xf32> to vector<16x1xf32>
    %294 = tpu.reciprocal %293 {approx = true} : vector<16x1xf32> -> vector<16x1xf32>
    %295 = vector.broadcast %294 : vector<16x1xf32> to vector<16x16xf32>
    %296 = arith.mulf %291, %295 : vector<16x16xf32>
    %297 = vector.extract_strided_slice %218 {offsets = [0, 24], sizes = [16, 8], strides = [1, 1]} : vector<16x32xf32> to vector<16x8xf32>
    %cst_120 = arith.constant dense<0.000000e+00> : vector<16x8xf32>
    %298 = tpu.matmul %296, %297, %cst_120 {dimension_numbers = #tpu.dot_dimension_numbers<[1], [0], [0], [1], [0, 0, 1, 1], [], []>} : vector<16x16xf32>, vector<16x8xf32>, vector<16x8xf32> -> vector<16x8xf32>
    %299 = vector.extract_strided_slice %220 {offsets = [24, 0], sizes = [8, 32], strides = [1, 1]} : vector<32x32xf32> to vector<8x32xf32>
    %cst_121 = arith.constant dense<0.000000e+00> : vector<16x32xf32>
    %300 = tpu.matmul %298, %299, %cst_121 {dimension_numbers = #tpu.dot_dimension_numbers<[1], [0], [0], [1], [0, 0, 1, 1], [], []>} : vector<16x8xf32>, vector<8x32xf32>, vector<16x32xf32> -> vector<16x32xf32>
    %301 = arith.addf %281, %300 : vector<16x32xf32>
    %c1_122 = arith.constant 1 : index
    %c0_123 = arith.constant 0 : index
    %c0_124 = arith.constant 0 : index
    %302 = vector.load %arg5[%c1_122, %c0_123, %c0_124] : memref<2x1x32xf32, #tpu.memory_space<vmem>>, vector<1x1x32xf32>
    %303 = vector.shape_cast %302 : vector<1x1x32xf32> to vector<1x32xf32>
    %304 = vector.broadcast %303 : vector<1x32xf32> to vector<16x32xf32>
    %305 = arith.addf %301, %304 : vector<16x32xf32>
    %306 = arith.addf %206, %305 : vector<16x32xf32>
    %cst_125 = arith.constant dense<0.000000e+00> : vector<16xf32>
    %307 = vector.multi_reduction <add>, %306, %cst_125 [1] : vector<16x32xf32> to vector<16xf32>
    %308 = vector.shape_cast %307 : vector<16xf32> to vector<16x1xf32>
    %cst_126 = arith.constant 3.200000e+01 : f32
    %309 = vector.broadcast %cst_126 : f32 to vector<16x1xf32>
    %310 = arith.divf %308, %309 : vector<16x1xf32>
    %311 = vector.broadcast %310 : vector<16x1xf32> to vector<16x32xf32>
    %312 = arith.subf %306, %311 : vector<16x32xf32>
    %313 = arith.mulf %312, %312 : vector<16x32xf32>
    %cst_127 = arith.constant dense<0.000000e+00> : vector<16xf32>
    %314 = vector.multi_reduction <add>, %313, %cst_127 [1] : vector<16x32xf32> to vector<16xf32>
    %315 = vector.shape_cast %314 : vector<16xf32> to vector<16x1xf32>
    %cst_128 = arith.constant 3.200000e+01 : f32
    %316 = vector.broadcast %cst_128 : f32 to vector<16x1xf32>
    %317 = arith.divf %315, %316 : vector<16x1xf32>
    %318 = vector.broadcast %310 : vector<16x1xf32> to vector<16x32xf32>
    %319 = arith.subf %306, %318 : vector<16x32xf32>
    %cst_129 = arith.constant 9.99999974E-6 : f32
    %320 = vector.broadcast %cst_129 : f32 to vector<16x1xf32>
    %321 = arith.addf %317, %320 : vector<16x1xf32>
    %322 = math.rsqrt %321 : vector<16x1xf32>
    %323 = vector.broadcast %322 : vector<16x1xf32> to vector<16x32xf32>
    %324 = arith.mulf %319, %323 : vector<16x32xf32>
    %c1_130 = arith.constant 1 : index
    %c0_131 = arith.constant 0 : index
    %c0_132 = arith.constant 0 : index
    %325 = vector.load %arg6[%c1_130, %c0_131, %c0_132] : memref<2x1x32xf32, #tpu.memory_space<vmem>>, vector<1x1x32xf32>
    %326 = vector.shape_cast %325 : vector<1x1x32xf32> to vector<1x32xf32>
    %327 = vector.broadcast %326 : vector<1x32xf32> to vector<16x32xf32>
    %328 = arith.mulf %324, %327 : vector<16x32xf32>
    %c1_133 = arith.constant 1 : index
    %c0_134 = arith.constant 0 : index
    %c0_135 = arith.constant 0 : index
    %329 = vector.load %arg7[%c1_133, %c0_134, %c0_135] : memref<2x1x32xf32, #tpu.memory_space<vmem>>, vector<1x1x32xf32>
    %330 = vector.shape_cast %329 : vector<1x1x32xf32> to vector<1x32xf32>
    %331 = vector.broadcast %330 : vector<1x32xf32> to vector<16x32xf32>
    %332 = arith.addf %328, %331 : vector<16x32xf32>
    %c1_136 = arith.constant 1 : index
    %c0_137 = arith.constant 0 : index
    %c0_138 = arith.constant 0 : index
    %333 = vector.load %arg8[%c1_136, %c0_137, %c0_138] : memref<2x32x64xf32, #tpu.memory_space<vmem>>, vector<1x32x64xf32>
    %334 = vector.shape_cast %333 : vector<1x32x64xf32> to vector<32x64xf32>
    %cst_139 = arith.constant dense<0.000000e+00> : vector<16x64xf32>
    %335 = tpu.matmul %332, %334, %cst_139 {dimension_numbers = #tpu.dot_dimension_numbers<[1], [0], [0], [1], [0, 0, 1, 1], [], []>} : vector<16x32xf32>, vector<32x64xf32>, vector<16x64xf32> -> vector<16x64xf32>
    %c1_140 = arith.constant 1 : index
    %c0_141 = arith.constant 0 : index
    %c0_142 = arith.constant 0 : index
    %336 = vector.load %arg9[%c1_140, %c0_141, %c0_142] : memref<2x1x64xf32, #tpu.memory_space<vmem>>, vector<1x1x64xf32>
    %337 = vector.shape_cast %336 : vector<1x1x64xf32> to vector<1x64xf32>
    %338 = vector.broadcast %337 : vector<1x64xf32> to vector<16x64xf32>
    %339 = arith.addf %335, %338 : vector<16x64xf32>
    %cst_143 = arith.constant 0.000000e+00 : f32
    %340 = vector.broadcast %cst_143 : f32 to vector<16x64xf32>
    %341 = arith.maximumf %339, %340 : vector<16x64xf32>
    %c1_144 = arith.constant 1 : index
    %c0_145 = arith.constant 0 : index
    %c0_146 = arith.constant 0 : index
    %342 = vector.load %arg10[%c1_144, %c0_145, %c0_146] : memref<2x64x32xf32, #tpu.memory_space<vmem>>, vector<1x64x32xf32>
    %343 = vector.shape_cast %342 : vector<1x64x32xf32> to vector<64x32xf32>
    %cst_147 = arith.constant dense<0.000000e+00> : vector<16x32xf32>
    %344 = tpu.matmul %341, %343, %cst_147 {dimension_numbers = #tpu.dot_dimension_numbers<[1], [0], [0], [1], [0, 0, 1, 1], [], []>} : vector<16x64xf32>, vector<64x32xf32>, vector<16x32xf32> -> vector<16x32xf32>
    %c1_148 = arith.constant 1 : index
    %c0_149 = arith.constant 0 : index
    %c0_150 = arith.constant 0 : index
    %345 = vector.load %arg11[%c1_148, %c0_149, %c0_150] : memref<2x1x32xf32, #tpu.memory_space<vmem>>, vector<1x1x32xf32>
    %346 = vector.shape_cast %345 : vector<1x1x32xf32> to vector<1x32xf32>
    %347 = vector.broadcast %346 : vector<1x32xf32> to vector<16x32xf32>
    %348 = arith.addf %344, %347 : vector<16x32xf32>
    %349 = arith.addf %332, %348 : vector<16x32xf32>
    %cst_151 = arith.constant dense<0.000000e+00> : vector<16xf32>
    %350 = vector.multi_reduction <add>, %349, %cst_151 [1] : vector<16x32xf32> to vector<16xf32>
    %351 = vector.shape_cast %350 : vector<16xf32> to vector<16x1xf32>
    %cst_152 = arith.constant 3.200000e+01 : f32
    %352 = vector.broadcast %cst_152 : f32 to vector<16x1xf32>
    %353 = arith.divf %351, %352 : vector<16x1xf32>
    %354 = vector.broadcast %353 : vector<16x1xf32> to vector<16x32xf32>
    %355 = arith.subf %349, %354 : vector<16x32xf32>
    %356 = arith.mulf %355, %355 : vector<16x32xf32>
    %cst_153 = arith.constant dense<0.000000e+00> : vector<16xf32>
    %357 = vector.multi_reduction <add>, %356, %cst_153 [1] : vector<16x32xf32> to vector<16xf32>
    %358 = vector.shape_cast %357 : vector<16xf32> to vector<16x1xf32>
    %cst_154 = arith.constant 3.200000e+01 : f32
    %359 = vector.broadcast %cst_154 : f32 to vector<16x1xf32>
    %360 = arith.divf %358, %359 : vector<16x1xf32>
    %361 = vector.broadcast %353 : vector<16x1xf32> to vector<16x32xf32>
    %362 = arith.subf %349, %361 : vector<16x32xf32>
    %cst_155 = arith.constant 9.99999974E-6 : f32
    %363 = vector.broadcast %cst_155 : f32 to vector<16x1xf32>
    %364 = arith.addf %360, %363 : vector<16x1xf32>
    %365 = math.rsqrt %364 : vector<16x1xf32>
    %366 = vector.broadcast %365 : vector<16x1xf32> to vector<16x32xf32>
    %367 = arith.mulf %362, %366 : vector<16x32xf32>
    %c1_156 = arith.constant 1 : index
    %c0_157 = arith.constant 0 : index
    %c0_158 = arith.constant 0 : index
    %368 = vector.load %arg12[%c1_156, %c0_157, %c0_158] : memref<2x1x32xf32, #tpu.memory_space<vmem>>, vector<1x1x32xf32>
    %369 = vector.shape_cast %368 : vector<1x1x32xf32> to vector<1x32xf32>
    %370 = vector.broadcast %369 : vector<1x32xf32> to vector<16x32xf32>
    %371 = arith.mulf %367, %370 : vector<16x32xf32>
    %c1_159 = arith.constant 1 : index
    %c0_160 = arith.constant 0 : index
    %c0_161 = arith.constant 0 : index
    %372 = vector.load %arg13[%c1_159, %c0_160, %c0_161] : memref<2x1x32xf32, #tpu.memory_space<vmem>>, vector<1x1x32xf32>
    %373 = vector.shape_cast %372 : vector<1x1x32xf32> to vector<1x32xf32>
    %374 = vector.broadcast %373 : vector<1x32xf32> to vector<16x32xf32>
    %375 = arith.addf %371, %374 : vector<16x32xf32>
    %c0_162 = arith.constant 0 : index
    %c0_163 = arith.constant 0 : index
    %376 = vector.load %arg14[%c0_162, %c0_163] : memref<16x32xf32, #tpu.memory_space<vmem>>, vector<16x32xf32>
    %377 = arith.mulf %375, %376 : vector<16x32xf32>
    %c0_164 = arith.constant 0 : index
    %c0_165 = arith.constant 0 : index
    %378 = vector.load %arg16[%c0_164, %c0_165] : memref<2x16xf32, #tpu.memory_space<vmem>>, vector<2x16xf32>
    %cst_166 = arith.constant dense<0.000000e+00> : vector<2x32xf32>
    %379 = tpu.matmul %378, %377, %cst_166 {dimension_numbers = #tpu.dot_dimension_numbers<[1], [0], [0], [1], [0, 0, 1, 1], [], []>} : vector<2x16xf32>, vector<16x32xf32>, vector<2x32xf32> -> vector<2x32xf32>
    %cst_167 = arith.constant dense<0.000000e+00> : vector<2xf32>
    %380 = vector.multi_reduction <add>, %379, %cst_167 [1] : vector<2x32xf32> to vector<2xf32>
    %381 = vector.shape_cast %380 : vector<2xf32> to vector<2x1xf32>
    %c0_168 = arith.constant 0 : index
    %c0_169 = arith.constant 0 : index
    %382 = vector.load %arg15[%c0_168, %c0_169] : memref<1x1xf32, #tpu.memory_space<vmem>>, vector<1x1xf32>
    %383 = vector.broadcast %382 : vector<1x1xf32> to vector<2x1xf32>
    %384 = arith.addf %381, %383 : vector<2x1xf32>
    %cst_170 = arith.constant dense<0xFF800000> : vector<1xf32>
    %385 = vector.multi_reduction <maximumf>, %384, %cst_170 [0] : vector<2x1xf32> to vector<1xf32>
    %386 = vector.shape_cast %385 : vector<1xf32> to vector<1x1xf32>
    %387 = vector.broadcast %386 : vector<1x1xf32> to vector<2x1xf32>
    %388 = arith.subf %384, %387 : vector<2x1xf32>
    %389 = math.exp %388 : vector<2x1xf32>
    %cst_171 = arith.constant dense<0.000000e+00> : vector<1xf32>
    %390 = vector.multi_reduction <add>, %389, %cst_171 [0] : vector<2x1xf32> to vector<1xf32>
    %391 = vector.shape_cast %390 : vector<1xf32> to vector<1x1xf32>
    %392 = vector.broadcast %391 : vector<1x1xf32> to vector<2x1xf32>
    %393 = arith.divf %389, %392 : vector<2x1xf32>
    %c0_172 = arith.constant 0 : index
    %c0_173 = arith.constant 0 : index
    %394 = vector.load %arg17[%c0_172, %c0_173] : memref<2x1xf32, #tpu.memory_space<vmem>>, vector<2x1xf32>
    tpu.vector_store %arg17[%c0_172, %c0_173], %393 {strides = array<i32>} : memref<2x1xf32, #tpu.memory_space<vmem>>, vector<2x1xf32>,
    return
  }
}

</mosaic_0001>

<bundles_post_ra>
// kernel: frame_scoring_forward.1
= control target key start
LH: loop header
LB: loop body
LE: loop exit
PB: predicated region body
PF: predicated region fallthrough
CT: control target
= control target key end

     0   :  { %s4902_s0 = inlined_call_operand.hbm [shape: f32[16,32], index: 0, kind: input, shape index: {}]   ;;  %s4903_s1 = inlined_call_operand.hbm [shape: f32[16,32], index: 1, kind: input, shape index: {}]   ;;  %s4904_s2 = inlined_call_operand.vmem [shape: f32[2,32,96], index: 2, kind: input, shape index: {}]   ;;  %s4905_s3 = inlined_call_operand.vmem [shape: f32[2,1,96], index: 3, kind: input, shape index: {}]   ;;  %s4906_s4 = inlined_call_operand.vmem [shape: f32[2,32,32], index: 4, kind: input, shape index: {}]   ;;  %s4907_s5 = inlined_call_operand.vmem [shape: f32[2,1,32], index: 5, kind: input, shape index: {}]   ;;  %s4908_s6 = inlined_call_operand.vmem [shape: f32[2,1,32], index: 6, kind: input, shape index: {}]   ;;  %s4909_s7 = inlined_call_operand.vmem [shape: f32[2,1,32], index: 7, kind: input, shape index: {}]   ;;  %s4910_s8 = inlined_call_operand.vmem [shape: f32[2,32,64], index: 8, kind: input, shape index: {}]   ;;  %s4911_s9 = inlined_call_operand.hbm [shape: f32[2,1,64], index: 9, kind: input, shape index: {}]   ;;  %s4912_s10 = inlined_call_operand.vmem [shape: f32[2,64,32], index: 10, kind: input, shape index: {}]   ;;  %s4913_s11 = inlined_call_operand.hbm [shape: f32[2,1,32], index: 11, kind: input, shape index: {}]   ;;  %s4914_s12 = inlined_call_operand.vmem [shape: f32[2,1,32], index: 12, kind: input, shape index: {}]   ;;  %s4915_s13 = inlined_call_operand.vmem [shape: f32[2,1,32], index: 13, kind: input, shape index: {}]   ;;  %s4916_s14 = inlined_call_operand.vmem [shape: f32[16,32], index: 14, kind: input, shape index: {}]   ;;  %s4917_s15 = inlined_call_operand.<no memory space> [shape: f32[1,1], index: 15, kind: input, shape index: {}]   ;;  %s4918_s16 = inlined_call_operand.vmem [shape: f32[2,16], index: 16, kind: input, shape index: {}]   ;;  %s4919_s17 = inlined_call_operand.vmem [shape: f32[2,1], index: 17, kind: output, shape index: {}]  }
   0x1   :  { %4925 = sst [smem:[#allocation13_spill]] %s4902_s0  ;;  %v22_v0 = vstv %s4917_s15 }
   0x2   :  { %4926 = sst [smem:[#allocation14_spill]] %s4903_s1  ;;  %23 = vst [vmem:[#allocation2] sm:$0x1] %v22_v0 }
   0x3   :  { %24 = vsyncpa [#allocation4], 0 }
   0x4   :  { %25 = vsyncpa [#allocation6], 0 }
   0x5   :  { %26 = vsyncpa [#allocation9], 0  ;;  %s4282_s26 = smov [#allocation5]   ;;  %s4283_s28 = smov [#allocation3]  }
   0x6   :  { %s44_s27 = sshll.u32 %s4282_s26, 4  ;;  %s32_s29 = sshll.u32 %s4283_s28, 4  ;;  %s45_s27 = int_to_ptr.vmem [resolvable:$true] %s44_s27  ;;  %s4397_s29 = int_to_ptr.vmem [resolvable:$true] %s32_s29 }
   0x7   :  { %s4927_s18 = sld [smem:[#allocation14_spill]] }
   0xd   :  { %s4188_s19 = scalar_lea.hbm %s4927_s18, 256 }
   0xe   :  { %p4189_p0 = scmp.ne.s32.totalorder %s4927_s18, %s4188_s19  ;;  %p4192_p1 = scmp.lt.u32.totalorder %s4188_s19, %s4927_s18 }
  0x10   :  { %p4194_p2 = pnand %p4192_p1, %p4189_p0 }
  0x12   :  { %4197 = shalt.err (!%p4194_p2)
}
  0x13   :  { %s4198_s22 = scalar_lea.vmem %s45_s27, 256  ;;  %p4203_p4 = scmp.lt.s32.totalorder %s45_s27, %s45_s27 }
  0x14   :  { %p4199_p3 = scmp.ne.s32.totalorder %s45_s27, %s4198_s22  ;;  %p4204_p5 = scmp.lt.s32.totalorder %s4198_s22, %s4198_s22 }
  0x16   :  { %p4205_p6 = por %p4204_p5, %p4203_p4 }
  0x18   :  { %p4206_p7 = pnand %p4205_p6, %p4199_p3 }
  0x1a   :  { %4209 = shalt.err (!%p4206_p7)
}
  0x1b   :  { %s4284_s23 = smov 128   ;;  %s4285_s24 = smov 8  }
  0x1c   :  { %50 = dma.hbm_to_vmem [thread:$0]  %s4927_s18, 256, %s45_s27, [#allocation6], %s4284_s23, %s4284_s23, %s4285_s24  }
  0x1d   :  { %s4928_s30 = sld [smem:[#allocation13_spill]] }
  0x23   :  { %s4210_s1 = scalar_lea.hbm %s4928_s30, 256 }
  0x24   :  { %p4211_p8 = scmp.ne.s32.totalorder %s4928_s30, %s4210_s1  ;;  %p4214_p9 = scmp.lt.u32.totalorder %s4210_s1, %s4928_s30 }
  0x26   :  { %p4216_p10 = pnand %p4214_p9, %p4211_p8 }
  0x28   :  { %4219 = shalt.err (!%p4216_p10)
}
  0x29   :  { %s4220_s22 = scalar_lea.vmem %s4397_s29, 256  ;;  %p4225_p12 = scmp.lt.s32.totalorder %s4397_s29, %s4397_s29 }
  0x2a   :  { %p4221_p11 = scmp.ne.s32.totalorder %s4397_s29, %s4220_s22  ;;  %p4226_p13 = scmp.lt.s32.totalorder %s4220_s22, %s4220_s22 }
  0x2c   :  { %p4227_p0 = por %p4226_p13, %p4225_p12 }
  0x2e   :  { %p4228_p1 = pnand %p4227_p0, %p4221_p11 }
  0x30   :  { %4231 = shalt.err (!%p4228_p1)
}
  0x31   :  { %38 = dma.hbm_to_vmem [thread:$0]  %s4928_s30, 256, %s4397_s29, [#allocation4], %s4284_s23, %s4284_s23, %s4285_s24  }
  0x32   :  { %s4286_s25 = smov [#allocation7]   ;;  %s4232_s1 = scalar_lea.hbm %s4911_s9, 32 }
  0x33   :  { %s70_s26 = sshll.u32 %s4286_s25, 4  ;;  %p4233_p2 = scmp.ne.s32.totalorder %s4911_s9, %s4232_s1  ;;  %s71_s26 = int_to_ptr.vmem [resolvable:$true] %s70_s26 }
  0x34   :  { %p4236_p3 = scmp.lt.u32.totalorder %s4232_s1, %s4911_s9 }
  0x36   :  { %p4238_p4 = pnand %p4236_p3, %p4233_p2 }
  0x38   :  { %4241 = shalt.err (!%p4238_p4)
}
  0x39   :  { %s4242_s22 = scalar_lea.vmem %s71_s26, 32  ;;  %p4247_p6 = scmp.lt.s32.totalorder %s71_s26, %s71_s26 }
  0x3a   :  { %p4243_p5 = scmp.ne.s32.totalorder %s71_s26, %s4242_s22  ;;  %p4248_p7 = scmp.lt.s32.totalorder %s4242_s22, %s4242_s22 }
  0x3c   :  { %p4249_p8 = por %p4248_p7, %p4247_p6 }
  0x3e   :  { %p4250_p9 = pnand %p4249_p8, %p4243_p5 }
  0x40   :  { %4253 = shalt.err (!%p4250_p9)
}
  0x41   :  { %s4287_s29 = smov 16   ;;  %s4288_s23 = smov 1  }
  0x42   :  { %76 = dma.hbm_to_vmem [thread:$0]  %s4911_s9, 32, %s71_s26, [#allocation6], %s4287_s29, %s4287_s29, %s4288_s23  }
  0x43   :  { %s4289_s27 = smov [#allocation8]   ;;  %s4254_s0 = scalar_lea.hbm %s4913_s11, 32 }
  0x44   :  { %s84_s18 = sshll.u32 %s4289_s27, 4  ;;  %p4255_p10 = scmp.ne.s32.totalorder %s4913_s11, %s4254_s0  ;;  %s85_s18 = int_to_ptr.vmem [resolvable:$true] %s84_s18 }
  0x45   :  { %p4258_p11 = scmp.lt.u32.totalorder %s4254_s0, %s4913_s11 }
  0x47   :  { %p4260_p12 = pnand %p4258_p11, %p4255_p10 }
  0x49   :  { %4263 = shalt.err (!%p4260_p12)
}
  0x4a   :  { %s4264_s21 = scalar_lea.vmem %s85_s18, 32  ;;  %p4269_p0 = scmp.lt.s32.totalorder %s85_s18, %s85_s18 }
  0x4b   :  { %p4265_p13 = scmp.ne.s32.totalorder %s85_s18, %s4264_s21  ;;  %p4270_p1 = scmp.lt.s32.totalorder %s4264_s21, %s4264_s21 }
  0x4d   :  { %p4271_p2 = por %p4270_p1, %p4269_p0 }
  0x4f   :  { %p4272_p3 = pnand %p4271_p2, %p4265_p13 }
  0x51   :  { %4275 = shalt.err (!%p4272_p3)
}
  0x52   :  { %90 = dma.hbm_to_vmem [thread:$0]  %s4913_s11, 32, %s85_s18, [#allocation9], %s4287_s29, %s4287_s29, %s4288_s23  }
  0x53   :  { %4276 = dma.done.wait [#allocation4], 256  }
  0x54   :  { %4277 = vsyncadd [#allocation4], 4294967040 }
  0x55   :  { %4278 = dma.done.wait [#allocation6], 288  }
  0x56   :  { %4279 = vsyncadd [#allocation6], 4294967008 }
  0x57   :  { %4280 = dma.done.wait [#allocation9], 32  }
  0x58   :  { %4281 = vsyncadd [#allocation9], 4294967264  ;;  %v162_v1 = vld [vmem:[%s4904_s2] sm:$0xff]  ;;  %v163_v2 = vld [vmem:[%s4904_s2 + $0x8] sm:$0xff]  ;;  %vm173_vm0 = vcmask 261120   ;;  %vm267_vm1 = vcmask 64512   ;;  %v119_v38 = vlaneseq }
  0x59   :  { %v164_v3 = vld [vmem:[%s4904_s2 + $0x10] sm:$0xff]  ;;  %v3843_v4 = vpack.c.bf16 %v163_v2, %v162_v1  ;;  %v165_v5 = vld [vmem:[%s4904_s2 + $0x18] sm:$0xff]  ;;  %v113_v6 = vld [vmem:[#allocation3] sm:$0xff]  ;;  %s4290_s0 = smov 96   ;;  %s4291_s1 = smov 120   ;;  %vm355_vm5 = vcmask 130048  }
  0x5a   :  { %v115_v7 = vld [vmem:[#allocation5] sm:$0xff]  ;;  %v3847_v8 = vpack.c.bf16 %v165_v5, %v164_v3  ;;  %v114_v10 = vld [vmem:[#allocation3 + $0x8] sm:$0xff]  ;;  %v116_v11 = vld [vmem:[#allocation5 + $0x8] sm:$0xff]  ;;  %s4292_s19 = smov 88   ;;  %s4293_s20 = smov 80   ;;  %v120_v39 = vshrl.u32 %v119_v38, 7 }
  0x5b   :  { %v4464_v9 = vadd.f32 %v115_v7, %v113_v6  ;;  %3844 = vmatprep.subr.bf16.mxu1 %v3843_v4  ;;  %v4468_v12 = vadd.f32 %v116_v11, %v114_v10  ;;  %v3347_v13 = vld [vmem:[%s4905_s3] ss:$0 sm:$0xff]  ;;  %s4294_s15 = smov 112   ;;  %vm4499_vm2 = vmpackc.low %vm267_vm1, %vm267_vm1  ;;  %v147_v41 = vand.u32 127, %v119_v38  ;;  %s4924_s21 = smov 56   ;;  %vm1564_vm6 = vcmask 523264  }
  0x5c   :  { %3846 = vmatpush3.bf16.msra.mxu1 %v3843_v4  ;;  %v121_v40 = vadd.s32 8, %v120_v39  ;;  %v126_v44 = vand.u32 1, %v120_v39  ;;  %s4296_s9 = smov 72   ;;  %s4297_s26 = smov 64   ;;  %v3403_v46 = vld [vmem:[%s4906_s4 + $0x30] sm:$0xff]  ;;  %vm4302_vm7 = vmmov 0  }
  0x5d   :  { %3610 = vmatprep.mubr.msk.f32.mxu1 %vm173_vm0, %v4464_v9  ;;  %3848 = vmatprep.subr.bf16.mxu1 %v3847_v8  ;;  %v152_v43 = vand.u32 1, %v147_v41  ;;  %s4298_s22 = smov 104   ;;  %s4923_s24 = smov 48   ;;  %vm3307_vm8 = vcmask 254976   ;;  %vm3319_vm9 = vcmask 1024  }
  0x5e   :  { %v133_v42 = vand.u32 1, %v121_v40  ;;  %s4922_s30 = smov 40  }
  0x5f   :  { %vm4525_vm4 = vcmp.eq.s32.totalorder %v126_v44, %v152_v43 }
  0x60   :  { %3850 = vmatpush3.bf16.msra.mxu1 %v3847_v8  ;;  %vm4521_vm3 = vcmp.eq.s32.totalorder %v133_v42, %v152_v43 }
  0x63   :  { %3611 = vmatmul.mubr.msk.f32.vlgmr.msra.gmra.mrb[0].mxu1 %vm173_vm0, %v4468_v12 }
 0x136   :  { %v3612_v14 = vpop.f32.mrb[0].mxu1 }
 0x137   :  { %v252_v15 = vadd.f32 %v3612_v14, %v3347_v13  ;;  %v246_v16 = vpop.f32.mrb[1].mxu1 }
 0x138   :  { %v247_v17 = vadd.f32 %v3347_v13, %v246_v16 }
 0x139   :  { %v4485_v20 = vmul.f32 0.35355338, %v252_v15 }
 0x13a   :  { %v4475_v18 = vpack.i.bf16 %v252_v15, %v247_v17  ;;  %v4477_v19 = vmul.f32 0.35355338, %v247_v17 }
 0x13c   :  { %4025 = vrot.lane.b32.xlu0 %v4475_v18, %s4290_s0  ;;  %465 = vrot.lane.b32.xlu1 %v4477_v19, %s4291_s1 }
 0x13d   :  { %3617 = vmatprep.mubr.msk.f32.mxu1 %vm267_vm1, %v4477_v19 }
 0x140   :  { %4030 = vrot.lane.b32.xlu0 %v4475_v18, %s4292_s19  ;;  %467 = vrot.lane.b32.xlu1 %v4485_v20, %s4291_s1 }
 0x144   :  { %4035 = vrot.lane.b32.xlu0 %v4475_v18, %s4293_s20  ;;  %829 = vrot.lane.b32.xlu1 %v4477_v19, %s4294_s15 }
 0x148   :  { %831 = vrot.lane.b32.xlu0 %v4485_v20, %s4294_s15 }
 0x1ae   :  { %v4026_v21 = vpop.permute.xlu0 %4025  ;;  %v466_v31 = vpop.permute.xlu1 %465 }
 0x1af   :  { %v4028_v22 = vunpack.i.h.bf16 %v4026_v21  ;;  %v4027_v23 = vunpack.i.l.bf16 %v4026_v21 }
 0x1b1   :  { %v3851_v25 = vpack.c.bf16 %v4028_v22, %v4027_v23 }
 0x1b2   :  { %v4031_v26 = vpop.permute.xlu0 %4030  ;;  %v468_v35 = vpop.permute.xlu1 %467 }
 0x1b3   :  { %v4033_v27 = vunpack.i.h.bf16 %v4031_v26  ;;  %v4032_v28 = vunpack.i.l.bf16 %v4031_v26  ;;  %3853 = vmatprep.subr.msk.bf16.mxu1 %vm4499_vm2, %v3851_v25 }
 0x1b4   :  { %3856 = vmatpush3.bf16.xpose.msk.msra.mxu1 %vm4499_vm2, %v3851_v25 }
 0x1b5   :  { %v3861_v29 = vpack.c.bf16 %v4033_v27, %v4032_v28 }
 0x1b6   :  { %v4036_v30 = vpop.permute.xlu0 %4035  ;;  %v830_v36 = vpop.permute.xlu1 %829 }
 0x1b7   :  { %v4038_v32 = vunpack.i.h.bf16 %v4036_v30  ;;  %v4037_v33 = vunpack.i.l.bf16 %v4036_v30  ;;  %3863 = vmatprep.subr.msk.bf16.mxu1 %vm4499_vm2, %v3861_v29 }
 0x1b9   :  { %v3871_v34 = vpack.c.bf16 %v4038_v32, %v4037_v33 }
 0x1ba   :  { %v832_v37 = vpop.permute.xlu0 %831 }
 0x1bb   :  { %3618 = vmatmul.mubr.msk.f32.vlgmr.msra.gmra.mrb[2].mxu1 %vm267_vm1, %v4485_v20 }
 0x1bc   :  { %3866 = vmatpush3.bf16.xpose.msk.msra.mxu1 %vm4499_vm2, %v3861_v29  ;;  %3631 = vmatprep.mubr.msk.f32.mxu1 %vm267_vm1, %v466_v31 }
 0x1bd   :  { %3873 = vmatprep.subr.msk.bf16.mxu1 %vm4499_vm2, %v3871_v34 }
 0x1c3   :  { %3632 = vmatmul.mubr.msk.f32.vlgmr.msra.gmra.mrb[4].mxu1 %vm267_vm1, %v468_v35 }
 0x1c4   :  { %3876 = vmatpush3.bf16.xpose.msk.msra.mxu1 %vm4499_vm2, %v3871_v34  ;;  %3655 = vmatprep.mubr.msk.f32.mxu1 %vm267_vm1, %v830_v36 }
 0x1cb   :  { %3656 = vmatmul.mubr.msk.f32.vlgmr.msra.gmra.mrb[6].mxu1 %vm267_vm1, %v832_v37 }
 0x28e   :  { %v3619_v47 = vpop.f32.mrb[2].mxu1 }
 0x28f   :  { %v354_v48 = vsel %vm4521_vm3, %v3619_v47, -1e+30  ;;  %v344_v49 = vpop.f32.mrb[3].mxu1 }
 0x290   :  { %v353_v50 = vsel %vm4525_vm4, %v344_v49, -1e+30  ;;  %v359_v51 = vsel %vm355_vm5, %v354_v48, -inf }
 0x291   :  { %360 = vmax.xlane.f32.xlu0 %v359_v51  ;;  %v356_v52 = vsel %vm355_vm5, %v353_v50, -inf }
 0x292   :  { %357 = vmax.xlane.f32.xlu1 %v356_v52 }
 0x296   :  { %v3633_v53 = vpop.f32.mrb[4].mxu1 }
 0x297   :  { %v557_v54 = vsel %vm4521_vm3, %v3633_v53, -1e+30  ;;  %v547_v55 = vpop.f32.mrb[5].mxu1 }
 0x298   :  { %v556_v56 = vsel %vm4525_vm4, %v547_v55, -1e+30  ;;  %v561_v57 = vsel %vm355_vm5, %v557_v54, -inf }
 0x299   :  { %562 = vmax.xlane.f32.xlu1 %v561_v57  ;;  %v558_v58 = vsel %vm355_vm5, %v556_v56, -inf }
 0x29a   :  { %559 = vmax.xlane.f32.xlu0 %v558_v58 }
 0x29e   :  { %v3657_v59 = vpop.f32.mrb[6].mxu1 }
 0x29f   :  { %v911_v60 = vpop.f32.mrb[7].mxu1  ;;  %v921_v23 = vsel %vm4521_vm3, %v3657_v59, -1e+30 }
 0x2a0   :  { %v920_v22 = vsel %vm4525_vm4, %v911_v60, -1e+30  ;;  %v925_v26 = vsel %vm355_vm5, %v921_v23, -inf }
 0x2a1   :  { %v922_v25 = vsel %vm355_vm5, %v920_v22, -inf }
 0x31e   :  { %v361_v61 = vpop.xlane.xlu0 %360 }
 0x31f   :  { %v363_v62 = vsub.f32 %v354_v48, %v361_v61  ;;  %v358_v63 = vpop.xlane.xlu1 %357 }
 0x320   :  { %v362_v0 = vsub.f32 %v353_v50, %v358_v63  ;;  %v257_v63 = vld [vmem:[%s4906_s4] sm:$0xff] }
 0x321   :  { %v366_v1 = vmul.f32 1.442695, %v363_v62  ;;  %v258_v62 = vld [vmem:[%s4906_s4 + $0x8] sm:$0xff] }
 0x322   :  { %v364_v2 = vmul.f32 1.442695, %v362_v0 }
 0x323   :  { %4104 = vpow2.f32 %v366_v1 }
 0x324   :  { %4106 = vpow2.f32 %v364_v2 }
 0x326   :  { %v563_v3 = vpop.xlane.xlu1 %562 }
 0x327   :  { %v565_v4 = vsub.f32 %v557_v54, %v563_v3  ;;  %v560_v5 = vpop.xlane.xlu0 %559 }
 0x328   :  { %v564_v6 = vsub.f32 %v556_v56, %v560_v5 }
 0x329   :  { %v568_v7 = vmul.f32 1.442695, %v565_v4 }
 0x32a   :  { %v566_v8 = vmul.f32 1.442695, %v564_v6 }
 0x32b   :  { %4108 = vpow2.f32 %v568_v7 }
 0x32c   :  { %4110 = vpow2.f32 %v566_v8 }
 0x32d   :  { %v4105_v10 = vpop.eup %4104 }
 0x32e   :  { %v4107_v11 = vpop.eup %4106  ;;  %v371_v13 = vsel %vm355_vm5, %v4105_v10, 0.0 }
 0x32f   :  { %372 = vadd.xlane.f32.xlu1 %v371_v13  ;;  %v368_v14 = vsel %vm355_vm5, %v4107_v11, 0.0 }
 0x330   :  { %369 = vadd.xlane.f32.xlu0 %v368_v14 }
 0x335   :  { %v4543_v15 = vpop.eup %4108 }
 0x336   :  { %v4111_v16 = vpop.eup %4110  ;;  %v573_v17 = vsel %vm355_vm5, %v4543_v15, 0.0 }
 0x337   :  { %574 = vadd.xlane.f32.xlu1 %v573_v17  ;;  %v570_v21 = vsel %vm355_vm5, %v4111_v16, 0.0 }
 0x338   :  { %571 = vadd.xlane.f32.xlu0 %v570_v21 }
 0x348   :  { %4045 = vrot.lane.b32.xlu1 %v4475_v18, %s4924_s21 }
 0x34c   :  { %4050 = vrot.lane.b32.xlu1 %v4475_v18, %s4296_s9 }
 0x34e   :  { %4040 = vrot.lane.b32.xlu0 %v4475_v18, %s4297_s26 }
 0x350   :  { %1116 = vrot.lane.b32.xlu1 %v4485_v20, %s4298_s22 }
 0x352   :  { %1114 = vrot.lane.b32.xlu0 %v4477_v19, %s4298_s22 }
 0x371   :  { %923 = vmax.xlane.f32.xlu0 %v922_v25 }
 0x374   :  { %926 = vmax.xlane.f32.xlu1 %v925_v26  ;;  %v259_v26 = vld [vmem:[%s4906_s4 + $0x10] sm:$0xff] }
 0x385   :  { %4055 = vrot.lane.b32.xlu1 %v4475_v18, %s4923_s24 }
 0x389   :  { %4060 = vrot.lane.b32.xlu1 %v4475_v18, %s4922_s30 }
 0x3bc   :  { %v373_v20 = vpop.xlane.xlu1 %372 }
 0x3bd   :  { %v370_v19 = vpop.xlane.xlu0 %369 }
 0x3be   :  { %4112 = vrcp.f32 %v370_v19 }
 0x3bf   :  { %4114 = vrcp.f32 %v373_v20 }
 0x3c4   :  { %v575_v27 = vpop.xlane.xlu1 %574 }
 0x3c5   :  { %v572_v28 = vpop.xlane.xlu0 %571 }
 0x3c6   :  { %4116 = vrcp.f32 %v572_v28 }
 0x3c7   :  { %4118 = vrcp.f32 %v575_v27 }
 0x3c8   :  { %v4113_v29 = vpop.eup %4112  ;;  %v4046_v30 = vpop.permute.xlu1 %4045 }
 0x3c9   :  { %v4041_v31 = vpop.permute.xlu0 %4040  ;;  %v376_v32 = vmul.f32 %v4113_v29, %v4107_v11  ;;  %v4048_v33 = vunpack.i.h.bf16 %v4046_v30  ;;  %v4047_v34 = vunpack.i.l.bf16 %v4046_v30  ;;  %v4115_v38 = vpop.eup %4114 }
 0x3ca   :  { %v4043_v35 = vunpack.i.h.bf16 %v4041_v31  ;;  %v4042_v36 = vunpack.i.l.bf16 %v4041_v31  ;;  %v377_v47 = vmul.f32 %v4115_v38, %v4105_v10 }
 0x3cb   :  { %3624 = vmatprep.mubr.msk.f32.mxu0 %vm355_vm5, %v376_v32  ;;  %v3867_v42 = vpack.c.bf16 %v4048_v33, %v4047_v34 }
 0x3cc   :  { %v4051_v37 = vpop.permute.xlu1 %4050  ;;  %v3857_v18 = vpack.c.bf16 %v4043_v35, %v4042_v36 }
 0x3cd   :  { %v4053_v39 = vunpack.i.h.bf16 %v4051_v37  ;;  %v4052_v40 = vunpack.i.l.bf16 %v4051_v37  ;;  %v1115_v41 = vpop.permute.xlu0 %1114 }
 0x3ce   :  { %3858 = vmatprep.subr.bf16.mxu0 %v3857_v18  ;;  %3674 = vmatprep.mubr.msk.f32.mxu1 %vm267_vm1, %v1115_v41 }
 0x3cf   :  { %v3881_v43 = vpack.c.bf16 %v4053_v39, %v4052_v40  ;;  %3860 = vmatpush3.bf16.msra.mxu0 %v3857_v18  ;;  %v260_v40 = vld [vmem:[%s4906_s4 + $0x18] sm:$0xff] }
 0x3d0   :  { %v4117_v44 = vpop.eup %4116  ;;  %3868 = vmatprep.subr.bf16.mxu0 %v3867_v42  ;;  %v1117_v51 = vpop.permute.xlu1 %1116 }
 0x3d1   :  { %v4119_v48 = vpop.eup %4118  ;;  %3883 = vmatprep.subr.msk.bf16.mxu1 %vm4499_vm2, %v3881_v43  ;;  %v578_v49 = vmul.f32 %v4117_v44, %v4111_v16 }
 0x3d2   :  { %3625 = vmatmul.mubr.msk.f32.vlgmr.msra.gmra.mrb[0].mxu0 %vm355_vm5, %v377_v47  ;;  %3886 = vmatpush3.bf16.xpose.msk.msra.mxu1 %vm4499_vm2, %v3881_v43  ;;  %v579_v50 = vmul.f32 %v4119_v48, %v4543_v15 }
 0x3d3   :  { %3870 = vmatpush3.bf16.msra.mxu0 %v3867_v42  ;;  %3638 = vmatprep.mubr.msk.f32.mxu0 %vm355_vm5, %v578_v49 }
 0x3d4   :  { %3641 = vmatprep.subr.mxu0 %v258_v62 }
 0x3d6   :  { %3639 = vmatmul.mubr.msk.f32.vlgmr.msra.gmra.mrb[2].mxu0 %vm355_vm5, %v579_v50 }
 0x3d7   :  { %3642 = vmatpush3.msra.mxu0 %v258_v62 }
 0x3d8   :  { %3646 = vmatprep.subr.mxu0 %v257_v63 }
 0x3d9   :  { %3675 = vmatmul.mubr.msk.f32.vlgmr.msra.gmra.mrb[8].mxu1 %vm267_vm1, %v1117_v51  ;;  %v3382_v51 = vld [vmem:[%s4907_s5] ss:$0 sm:$0xff] }
 0x3fe   :  { %v924_v52 = vpop.xlane.xlu0 %923 }
 0x3ff   :  { %v928_v53 = vsub.f32 %v920_v22, %v924_v52 }
 0x401   :  { %v930_v54 = vmul.f32 1.442695, %v928_v53  ;;  %v927_v55 = vpop.xlane.xlu1 %926 }
 0x402   :  { %v929_v56 = vsub.f32 %v921_v23, %v927_v55 }
 0x403   :  { %4120 = vpow2.f32 %v930_v54 }
 0x404   :  { %v932_v57 = vmul.f32 1.442695, %v929_v56 }
 0x405   :  { %v4056_v1 = vpop.permute.xlu1 %4055 }
 0x406   :  { %4122 = vpow2.f32 %v932_v57  ;;  %v4058_v5 = vunpack.i.h.bf16 %v4056_v1  ;;  %v4057_v6 = vunpack.i.l.bf16 %v4056_v1 }
 0x408   :  { %v3877_v10 = vpack.c.bf16 %v4058_v5, %v4057_v6  ;;  %v1456_v5 = vld [vmem:[%s4910_s8 + $0x8] sm:$0xff] }
 0x409   :  { %v4061_v21 = vpop.permute.xlu1 %4060 }
 0x40a   :  { %v4063_v19 = vunpack.i.h.bf16 %v4061_v21  ;;  %v4062_v20 = vunpack.i.l.bf16 %v4061_v21  ;;  %v1553_v21 = vld [vmem:[%s4912_s10 + $0x20] sm:$0xff] }
 0x40c   :  { %v3887_v28 = vpack.c.bf16 %v4063_v19, %v4062_v20 }
 0x40d   :  { %v4121_v58 = vpop.eup %4120 }
 0x40e   :  { %v934_v59 = vsel %vm355_vm5, %v4121_v58, 0.0 }
 0x40f   :  { %935 = vadd.xlane.f32.xlu0 %v934_v59 }
 0x410   :  { %v4123_v60 = vpop.eup %4122 }
 0x411   :  { %v937_v61 = vsel %vm355_vm5, %v4123_v60, 0.0 }
 0x413   :  { %938 = vadd.xlane.f32.xlu0 %v937_v61 }
 0x49c   :  { %v936_v0 = vpop.xlane.xlu0 %935 }
 0x49d   :  { %4124 = vrcp.f32 %v936_v0 }
 0x4a0   :  { %v939_v3 = vpop.xlane.xlu0 %938 }
 0x4a1   :  { %4126 = vrcp.f32 %v939_v3 }
 0x4a5   :  { %v3626_v2 = vpop.f32.mrb[0].mxu0 }
 0x4a6   :  { %v456_v4 = vpop.f32.mrb[1].mxu0 }
 0x4a7   :  { %v4125_v16 = vpop.eup %4124 }
 0x4a8   :  { %v942_v25 = vmul.f32 %v4125_v16, %v4121_v58  ;;  %v1552_v16 = vld [vmem:[%s4912_s10 + $0x18] sm:$0xff] }
 0x4a9   :  { %v3640_v7 = vpop.f32.mrb[2].mxu0 }
 0x4aa   :  { %v658_v8 = vpop.f32.mrb[3].mxu0 }
 0x4ab   :  { %3643 = vmatprep.mubr.msk.f32.mxu0 %vm267_vm1, %v658_v8  ;;  %v4127_v22 = vpop.eup %4126  ;;  %v1458_v8 = vld [vmem:[%s4910_s8 + $0x18] sm:$0xff] }
 0x4ac   :  { %3644 = vmatmul.mubr.msk.f32.vlgmr.msra.gmra.mrb[4].mxu0 %vm267_vm1, %v3640_v7  ;;  %v3676_v11 = vpop.f32.mrb[8].mxu1  ;;  %v943_v27 = vmul.f32 %v4127_v22, %v4123_v60  ;;  %v1457_v7 = vld [vmem:[%s4910_s8 + $0x10] sm:$0xff]  ;;  %v1554_v22 = vld [vmem:[%s4912_s10 + $0x28] sm:$0xff] }
 0x4ad   :  { %3647 = vmatpush3.msra.mxu0 %v257_v63  ;;  %3648 = vmatprep.mubr.msk.f32.mxu0 %vm267_vm1, %v456_v4  ;;  %v1196_v13 = vpop.f32.mrb[9].mxu1  ;;  %v1206_v17 = vsel %vm4521_vm3, %v3676_v11, -1e+30  ;;  %v1549_v11 = vld [vmem:[%s4912_s10] sm:$0xff] }
 0x4ae   :  { %3878 = vmatprep.subr.bf16.mxu0 %v3877_v10  ;;  %v1205_v14 = vsel %vm4525_vm4, %v1196_v13, -1e+30  ;;  %v1210_v23 = vsel %vm355_vm5, %v1206_v17, -inf  ;;  %v1550_v13 = vld [vmem:[%s4912_s10 + $0x8] sm:$0xff] }
 0x4af   :  { %v1207_v15 = vsel %vm355_vm5, %v1205_v14, -inf }
 0x4b0   :  { %1208 = vmax.xlane.f32.xlu0 %v1207_v15  ;;  %v3899_v15 = vpack.c.bf16 %v1550_v13, %v1549_v11 }
 0x4b4   :  { %1211 = vmax.xlane.f32.xlu0 %v1210_v23  ;;  %3649 = vmatmul.mubr.msk.f32.vlgmr.msra.gmra.mrb[4].mxu0 %vm267_vm1, %v3626_v2  ;;  %v3907_v23 = vpack.c.bf16 %v1554_v22, %v1553_v21  ;;  %v3391_v21 = vld [vmem:[%s4914_s12] ss:$0 sm:$0xff] }
 0x4b5   :  { %3880 = vmatpush3.bf16.msra.mxu0 %v3877_v10  ;;  %3662 = vmatprep.mubr.msk.f32.mxu0 %vm355_vm5, %v942_v25  ;;  %v3895_v10 = vpack.c.bf16 %v1458_v8, %v1457_v7  ;;  %v3396_v7 = vld [vmem:[%s4904_s2 + $0x38] sm:$0xff] }
 0x4b6   :  { %3665 = vmatprep.subr.mxu0 %v259_v26 }
 0x4b8   :  { %3663 = vmatmul.mubr.msk.f32.vlgmr.msra.gmra.mrb[6].mxu0 %vm355_vm5, %v943_v27 }
 0x4b9   :  { %3666 = vmatpush3.msra.mxu0 %v259_v26 }
 0x4ba   :  { %3888 = vmatprep.subr.bf16.mxu0 %v3887_v28 }
 0x53d   :  { %v1209_v29 = vpop.xlane.xlu0 %1208 }
 0x53e   :  { %v1213_v30 = vsub.f32 %v1205_v14, %v1209_v29  ;;  %v1551_v14 = vld [vmem:[%s4912_s10 + $0x10] sm:$0xff] }
 0x540   :  { %v1215_v31 = vmul.f32 1.442695, %v1213_v30  ;;  %v3383_v30 = vld [vmem:[%s4908_s6] ss:$0 sm:$0xff] }
 0x541   :  { %v1212_v32 = vpop.xlane.xlu0 %1211 }
 0x542   :  { %4128 = vpow2.f32 %v1215_v31  ;;  %v1214_v33 = vsub.f32 %v1206_v17, %v1212_v32  ;;  %v3903_v17 = vpack.c.bf16 %v1552_v16, %v1551_v14  ;;  %v3384_v32 = vld [vmem:[%s4909_s7] ss:$0 sm:$0xff] }
 0x544   :  { %v1217_v34 = vmul.f32 1.442695, %v1214_v33 }
 0x546   :  { %4130 = vpow2.f32 %v1217_v34 }
 0x54c   :  { %v4129_v35 = vpop.eup %4128 }
 0x54d   :  { %v1219_v36 = vsel %vm355_vm5, %v4129_v35, 0.0 }
 0x54e   :  { %1220 = vadd.xlane.f32.xlu0 %v1219_v36 }
 0x550   :  { %v4131_v37 = vpop.eup %4130 }
 0x551   :  { %v1222_v18 = vsel %vm355_vm5, %v4131_v37, 0.0 }
 0x552   :  { %1223 = vadd.xlane.f32.xlu0 %v1222_v18 }
 0x58b   :  { %v3664_v38 = vpop.f32.mrb[6].mxu0 }
 0x58c   :  { %v1022_v39 = vpop.f32.mrb[7].mxu0 }
 0x58d   :  { %3667 = vmatprep.mubr.msk.f32.mxu0 %vm267_vm1, %v1022_v39  ;;  %v1556_v39 = vld [vmem:[%s4912_s10 + $0x38] sm:$0xff] }
 0x58e   :  { %3668 = vmatmul.mubr.msk.f32.vlgmr.msra.gmra.mrb[4].mxu0 %vm267_vm1, %v3664_v38  ;;  %v1555_v38 = vld [vmem:[%s4912_s10 + $0x30] sm:$0xff] }
 0x58f   :  { %3890 = vmatpush3.bf16.msra.mxu0 %v3887_v28 }
 0x590   :  { %3684 = vmatprep.subr.mxu0 %v260_v40 }
 0x5db   :  { %v1221_v41 = vpop.xlane.xlu0 %1220 }
 0x5dc   :  { %4132 = vrcp.f32 %v1221_v41  ;;  %v3385_v41 = vld [vmem:[#allocation7] ss:$0 sm:$0xff] }
 0x5df   :  { %v1224_v42 = vpop.xlane.xlu0 %1223 }
 0x5e0   :  { %4134 = vrcp.f32 %v1224_v42 }
 0x5e6   :  { %v4133_v43 = vpop.eup %4132 }
 0x5e7   :  { %v1227_v44 = vmul.f32 %v4133_v43, %v4129_v35 }
 0x5e9   :  { %3681 = vmatprep.mubr.msk.f32.mxu0 %vm355_vm5, %v1227_v44 }
 0x5ea   :  { %v4135_v47 = vpop.eup %4134 }
 0x5eb   :  { %v1228_v48 = vmul.f32 %v4135_v47, %v4131_v37 }
 0x5ed   :  { %3682 = vmatmul.mubr.msk.f32.vlgmr.msra.gmra.mrb[8].mxu0 %vm355_vm5, %v1228_v48 }
 0x5ee   :  { %3685 = vmatpush3.msra.mxu0 %v260_v40  ;;  %v3911_v40 = vpack.c.bf16 %v1556_v39, %v1555_v38 }
 0x5ef   :  { %3900 = vmatprep.subr.bf16.mxu0 %v3899_v15 }
 0x6c0   :  { %v3683_v49 = vpop.f32.mrb[8].mxu0 }
 0x6c1   :  { %v1307_v50 = vpop.f32.mrb[9].mxu0 }
 0x6c2   :  { %3686 = vmatprep.mubr.msk.f32.mxu0 %vm267_vm1, %v1307_v50  ;;  %v3388_v50 = vld [vmem:[#allocation8] ss:$0 sm:$0xff] }
 0x6c3   :  { %3687 = vmatmul.mubr.msk.f32.vlgmr.msra.gmra.mrb[4].mxu0 %vm267_vm1, %v3683_v49 }
 0x6c4   :  { %3902 = vmatpush3.bf16.msra.mxu0 %v3899_v15 }
 0x6c5   :  { %3904 = vmatprep.subr.bf16.mxu0 %v3903_v17 }
 0x6c8   :  { %3906 = vmatpush3.bf16.msra.mxu0 %v3903_v17 }
 0x6c9   :  { %3908 = vmatprep.subr.bf16.mxu0 %v3907_v23 }
 0x6cc   :  { %3910 = vmatpush3.bf16.msra.mxu0 %v3907_v23  ;;  %v3392_v23 = vld [vmem:[%s4915_s13] ss:$0 sm:$0xff] }
 0x6cd   :  { %3912 = vmatprep.subr.bf16.mxu0 %v3911_v40 }
 0x6d0   :  { %3914 = vmatpush3.bf16.msra.mxu0 %v3911_v40 }
 0x796   :  { %v3688_v52 = vpop.f32.mrb[4].mxu0 }
 0x797   :  { %v1407_v53 = vadd.f32 %v3688_v52, %v3382_v51  ;;  %v1388_v54 = vpop.f32.mrb[5].mxu0 }
 0x798   :  { %v1406_v55 = vadd.f32 %v3382_v51, %v1388_v54 }
 0x799   :  { %v1409_v56 = vadd.f32 %v1407_v53, %v4468_v12 }
 0x79a   :  { %v1408_v57 = vadd.f32 %v1406_v55, %v4464_v9  ;;  %v1455_v9 = vld [vmem:[%s4910_s8] sm:$0xff] }
 0x79b   :  { %v1413_v58 = vsel %vm173_vm0, %v1409_v56, 0.0  ;;  %v3891_v6 = vpack.c.bf16 %v1456_v5, %v1455_v9  ;;  %v3394_v9 = vld [vmem:[%s4904_s2 + $0x28] sm:$0xff] }
 0x79c   :  { %1414 = vadd.xlane.f32.xlu1 %v1413_v58  ;;  %v1410_v59 = vsel %vm173_vm0, %v1408_v57, 0.0 }
 0x79d   :  { %1411 = vadd.xlane.f32.xlu0 %v1410_v59  ;;  %3892 = vmatprep.subr.bf16.mxu1 %v3891_v6 }
 0x79e   :  { %3894 = vmatpush3.bf16.msra.mxu1 %v3891_v6  ;;  %v3395_v6 = vld [vmem:[%s4904_s2 + $0x30] sm:$0xff] }
 0x79f   :  { %3896 = vmatprep.subr.bf16.mxu1 %v3895_v10  ;;  %v3919_v8 = vpack.c.bf16 %v3396_v7, %v3395_v6 }
 0x7a2   :  { %3898 = vmatpush3.bf16.msra.mxu1 %v3895_v10 }
 0x829   :  { %v1415_v60 = vpop.xlane.xlu1 %1414 }
 0x82a   :  { %v1418_v61 = vmul.f32 0.03125, %v1415_v60  ;;  %v1412_v62 = vpop.xlane.xlu0 %1411 }
 0x82b   :  { %v1417_v63 = vmul.f32 0.03125, %v1412_v62 }
 0x82c   :  { %v1420_v0 = vsub.f32 %v1409_v56, %v1418_v61 }
 0x82d   :  { %v1419_v1 = vsub.f32 %v1408_v57, %v1417_v63 }
 0x82e   :  { %v1422_v4 = vmul.f32 %v1420_v0, %v1420_v0 }
 0x82f   :  { %v1421_v2 = vmul.f32 %v1419_v1, %v1419_v1 }
 0x830   :  { %v1426_v12 = vsel %vm173_vm0, %v1422_v4, 0.0 }
 0x831   :  { %v1423_v3 = vsel %vm173_vm0, %v1421_v2, 0.0 }
 0x832   :  { %1424 = vadd.xlane.f32.xlu0 %v1423_v3 }
 0x836   :  { %1427 = vadd.xlane.f32.xlu0 %v1426_v12  ;;  %v3393_v12 = vld [vmem:[%s4904_s2 + $0x20] sm:$0xff] }
 0x837   :  { %v3915_v5 = vpack.c.bf16 %v3394_v9, %v3393_v12 }
 0x839   :  { %3916 = vmatprep.subr.bf16.mxu1 %v3915_v5 }
 0x8bf   :  { %v1425_v25 = vpop.xlane.xlu0 %1424 }
 0x8c0   :  { %v1429_v26 = vmul.f32 0.03125, %v1425_v25 }
 0x8c2   :  { %v1431_v19 = vadd.f32 1e-05, %v1429_v26 }
 0x8c3   :  { %v1428_v20 = vpop.xlane.xlu0 %1427 }
 0x8c4   :  { %4136 = vrsqrt.f32 %v1431_v19  ;;  %v1430_v27 = vmul.f32 0.03125, %v1428_v20 }
 0x8c6   :  { %v1432_v28 = vadd.f32 1e-05, %v1430_v27 }
 0x8c8   :  { %4138 = vrsqrt.f32 %v1432_v28 }
 0x8ce   :  { %v4137_v29 = vpop.eup %4136 }
 0x8cf   :  { %v1435_v31 = vmul.f32 %v4137_v29, %v1419_v1  ;;  %v3398_v29 = vld [vmem:[%s4905_s3 + $0x1] ss:$0 sm:$0xff]  ;;  %s4935_s3 = smov 56  }
 0x8d1   :  { %v1444_v33 = vmul.f32 %v3383_v30, %v1435_v31 }
 0x8d2   :  { %v4139_v34 = vpop.eup %4138 }
 0x8d3   :  { %v1436_v35 = vmul.f32 %v4139_v34, %v1420_v0  ;;  %v1453_v36 = vadd.f32 %v3384_v32, %v1444_v33 }
 0x8d5   :  { %v1445_v37 = vmul.f32 %v3383_v30, %v1436_v35  ;;  %3697 = vmatprep.mubr.msk.f32.mxu1 %vm173_vm0, %v1453_v36 }
 0x8d7   :  { %v1454_v18 = vadd.f32 %v3384_v32, %v1445_v37 }
 0x8d9   :  { %3698 = vmatmul.mubr.msk.f32.vlgmr.msra.gmra.mrb[10].mxu1 %vm173_vm0, %v1454_v18 }
 0x8da   :  { %3918 = vmatpush3.bf16.msra.mxu1 %v3915_v5 }
 0x8db   :  { %3920 = vmatprep.subr.bf16.mxu1 %v3919_v8 }
 0x8de   :  { %3922 = vmatpush3.bf16.msra.mxu1 %v3919_v8 }
 0x9ac   :  { %v3699_v42 = vpop.f32.mrb[10].mxu1 }
 0x9ad   :  { %v1544_v43 = vadd.f32 %v3699_v42, %v3385_v41  ;;  %v1538_v44 = vpop.f32.mrb[11].mxu1 }
 0x9ae   :  { %v1539_v47 = vadd.f32 %v3385_v41, %v1538_v44 }
 0x9af   :  { %v1548_v49 = vmax.f32 %v1544_v43, 0.0 }
 0x9b0   :  { %v1547_v48 = vmax.f32 %v1539_v47, 0.0 }
 0x9b2   :  { %3716 = vmatprep.mubr.msk.f32.mxu0 %vm1564_vm6, %v1547_v48 }
 0x9b3   :  { %3717 = vmatmul.mubr.msk.f32.vlgmr.msra.gmra.mrb[10].mxu0 %vm1564_vm6, %v1548_v49 }
 0xa86   :  { %v3718_v51 = vpop.f32.mrb[10].mxu0 }
 0xa87   :  { %v1637_v52 = vpop.f32.mrb[11].mxu0  ;;  %v1643_v53 = vadd.f32 %v3718_v51, %v3388_v50 }
 0xa88   :  { %v1638_v54 = vadd.f32 %v3388_v50, %v1637_v52 }
 0xa89   :  { %v1647_v57 = vadd.f32 %v1643_v53, %v1454_v18 }
 0xa8a   :  { %v1646_v55 = vadd.f32 %v1638_v54, %v1453_v36 }
 0xa8b   :  { %v1651_v58 = vsel %vm173_vm0, %v1647_v57, 0.0 }
 0xa8c   :  { %v1648_v56 = vsel %vm173_vm0, %v1646_v55, 0.0 }
 0xa8d   :  { %1649 = vadd.xlane.f32.xlu0 %v1648_v56 }
 0xa91   :  { %1652 = vadd.xlane.f32.xlu0 %v1651_v58 }
 0xb1a   :  { %v1650_v59 = vpop.xlane.xlu0 %1649 }
 0xb1b   :  { %v1654_v60 = vmul.f32 0.03125, %v1650_v59 }
 0xb1d   :  { %v1656_v61 = vsub.f32 %v1646_v55, %v1654_v60 }
 0xb1e   :  { %v1653_v62 = vpop.xlane.xlu0 %1652 }
 0xb1f   :  { %v1655_v63 = vmul.f32 0.03125, %v1653_v62  ;;  %v1658_v0 = vmul.f32 %v1656_v61, %v1656_v61 }
 0xb21   :  { %v1657_v1 = vsub.f32 %v1647_v57, %v1655_v63  ;;  %v1660_v2 = vsel %vm173_vm0, %v1658_v0, 0.0 }
 0xb22   :  { %1661 = vadd.xlane.f32.xlu0 %v1660_v2 }
 0xb23   :  { %v1659_v3 = vmul.f32 %v1657_v1, %v1657_v1 }
 0xb25   :  { %v1663_v4 = vsel %vm173_vm0, %v1659_v3, 0.0 }
 0xb26   :  { %1664 = vadd.xlane.f32.xlu0 %v1663_v4 }
 0xbaf   :  { %v1662_v10 = vpop.xlane.xlu0 %1661 }
 0xbb0   :  { %v1666_v11 = vmul.f32 0.03125, %v1662_v10 }
 0xbb2   :  { %v1668_v13 = vadd.f32 1e-05, %v1666_v11 }
 0xbb3   :  { %v1665_v14 = vpop.xlane.xlu0 %1664 }
 0xbb4   :  { %4140 = vrsqrt.f32 %v1668_v13  ;;  %v1667_v15 = vmul.f32 0.03125, %v1665_v14 }
 0xbb6   :  { %v1669_v16 = vadd.f32 1e-05, %v1667_v15 }
 0xbb8   :  { %4142 = vrsqrt.f32 %v1669_v16 }
 0xbbe   :  { %v4141_v17 = vpop.eup %4140 }
 0xbbf   :  { %v1672_v22 = vmul.f32 %v4141_v17, %v1656_v61 }
 0xbc1   :  { %v1681_v25 = vmul.f32 %v3391_v21, %v1672_v22 }
 0xbc2   :  { %v4143_v26 = vpop.eup %4142 }
 0xbc3   :  { %v1673_v19 = vmul.f32 %v4143_v26, %v1657_v1  ;;  %v4690_v20 = vadd.f32 %v3392_v23, %v1681_v25 }
 0xbc5   :  { %v1682_v27 = vmul.f32 %v3391_v21, %v1673_v19  ;;  %3727 = vmatprep.mubr.msk.f32.mxu1 %vm173_vm0, %v4690_v20 }
 0xbc7   :  { %v4694_v28 = vadd.f32 %v3392_v23, %v1682_v27 }
 0xbc9   :  { %3728 = vmatmul.mubr.msk.f32.vlgmr.msra.gmra.mrb[12].mxu1 %vm173_vm0, %v4694_v28 }
 0xc9c   :  { %v3729_v30 = vpop.f32.mrb[12].mxu1 }
 0xc9d   :  { %v1783_v31 = vadd.f32 %v3729_v30, %v3398_v29  ;;  %v1777_v32 = vpop.f32.mrb[13].mxu1 }
 0xc9e   :  { %v1778_v33 = vadd.f32 %v3398_v29, %v1777_v32 }
 0xc9f   :  { %v4715_v36 = vmul.f32 0.35355338, %v1783_v31 }
 0xca0   :  { %v4701_v34 = vpack.i.bf16 %v1783_v31, %v1778_v33  ;;  %v4703_v35 = vmul.f32 0.35355338, %v1778_v33 }
 0xca2   :  { %4070 = vrot.lane.b32.xlu1 %v4701_v34, %s4292_s19  ;;  %4065 = vrot.lane.b32.xlu0 %v4701_v34, %s4290_s0  ;;  %s4936_s0 = smov 48  }
 0xca3   :  { %3734 = vmatprep.mubr.msk.f32.mxu1 %vm267_vm1, %v4703_v35 }
 0xca6   :  { %4075 = vrot.lane.b32.xlu1 %v4701_v34, %s4293_s20  ;;  %1995 = vrot.lane.b32.xlu0 %v4703_v35, %s4291_s1 }
 0xcaa   :  { %2361 = vrot.lane.b32.xlu1 %v4715_v36, %s4294_s15  ;;  %1997 = vrot.lane.b32.xlu0 %v4715_v36, %s4291_s1 }
 0xcae   :  { %2359 = vrot.lane.b32.xlu0 %v4703_v35, %s4294_s15 }
 0xd14   :  { %v4071_v37 = vpop.permute.xlu1 %4070  ;;  %v4066_v18 = vpop.permute.xlu0 %4065 }
 0xd15   :  { %v4073_v38 = vunpack.i.h.bf16 %v4071_v37  ;;  %v4072_v39 = vunpack.i.l.bf16 %v4071_v37  ;;  %v4068_v40 = vunpack.i.h.bf16 %v4066_v18  ;;  %v4067_v41 = vunpack.i.l.bf16 %v4066_v18 }
 0xd17   :  { %v3923_v42 = vpack.c.bf16 %v4068_v40, %v4067_v41  ;;  %v3933_v43 = vpack.c.bf16 %v4073_v38, %v4072_v39 }
 0xd18   :  { %v4076_v44 = vpop.permute.xlu1 %4075  ;;  %v1996_v49 = vpop.permute.xlu0 %1995 }
 0xd19   :  { %3925 = vmatprep.subr.msk.bf16.mxu1 %vm4499_vm2, %v3923_v42  ;;  %v4078_v47 = vunpack.i.h.bf16 %v4076_v44  ;;  %v4077_v48 = vunpack.i.l.bf16 %v4076_v44 }
 0xd1a   :  { %3928 = vmatpush3.bf16.xpose.msk.msra.mxu1 %vm4499_vm2, %v3923_v42 }
 0xd1b   :  { %3935 = vmatprep.subr.msk.bf16.mxu1 %vm4499_vm2, %v3933_v43  ;;  %v3943_v50 = vpack.c.bf16 %v4078_v47, %v4077_v48 }
 0xd1c   :  { %v1998_v51 = vpop.permute.xlu0 %1997  ;;  %v2362_v53 = vpop.permute.xlu1 %2361 }
 0xd20   :  { %v2360_v52 = vpop.permute.xlu0 %2359 }
 0xd21   :  { %3735 = vmatmul.mubr.msk.f32.vlgmr.msra.gmra.mrb[14].mxu1 %vm267_vm1, %v4715_v36 }
 0xd22   :  { %3938 = vmatpush3.bf16.xpose.msk.msra.mxu1 %vm4499_vm2, %v3933_v43  ;;  %3748 = vmatprep.mubr.msk.f32.mxu1 %vm267_vm1, %v1996_v49 }
 0xd23   :  { %3945 = vmatprep.subr.msk.bf16.mxu1 %vm4499_vm2, %v3943_v50 }
 0xd29   :  { %3749 = vmatmul.mubr.msk.f32.vlgmr.msra.gmra.mrb[16].mxu1 %vm267_vm1, %v1998_v51 }
 0xd2a   :  { %3948 = vmatpush3.bf16.xpose.msk.msra.mxu1 %vm4499_vm2, %v3943_v50  ;;  %3772 = vmatprep.mubr.msk.f32.mxu1 %vm267_vm1, %v2360_v52 }
 0xd31   :  { %3773 = vmatmul.mubr.msk.f32.vlgmr.msra.gmra.mrb[18].mxu1 %vm267_vm1, %v2362_v53 }
 0xdf4   :  { %v3736_v54 = vpop.f32.mrb[14].mxu1 }
 0xdf5   :  { %v1885_v55 = vsel %vm4521_vm3, %v3736_v54, -1e+30  ;;  %v1875_v56 = vpop.f32.mrb[15].mxu1 }
 0xdf6   :  { %v1884_v57 = vsel %vm4525_vm4, %v1875_v56, -1e+30  ;;  %v1889_v58 = vsel %vm355_vm5, %v1885_v55, -inf }
 0xdf7   :  { %1890 = vmax.xlane.f32.xlu1 %v1889_v58  ;;  %v1886_v59 = vsel %vm355_vm5, %v1884_v57, -inf }
 0xdf8   :  { %1887 = vmax.xlane.f32.xlu0 %v1886_v59 }
 0xdfc   :  { %v3750_v60 = vpop.f32.mrb[16].mxu1 }
 0xdfd   :  { %v2077_v61 = vpop.f32.mrb[17].mxu1  ;;  %v2087_v0 = vsel %vm4521_vm3, %v3750_v60, -1e+30 }
 0xdfe   :  { %v2086_v62 = vsel %vm4525_vm4, %v2077_v61, -1e+30  ;;  %v2091_v1 = vsel %vm355_vm5, %v2087_v0, -inf }
 0xdff   :  { %v2088_v63 = vsel %vm355_vm5, %v2086_v62, -inf }
 0xe00   :  { %2089 = vmax.xlane.f32.xlu0 %v2088_v63 }
 0xe04   :  { %v3774_v2 = vpop.f32.mrb[18].mxu1  ;;  %2092 = vmax.xlane.f32.xlu0 %v2091_v1 }
 0xe05   :  { %v2441_v3 = vpop.f32.mrb[19].mxu1  ;;  %v2451_v27 = vsel %vm4521_vm3, %v3774_v2, -1e+30 }
 0xe06   :  { %v2450_v29 = vsel %vm4525_vm4, %v2441_v3, -1e+30  ;;  %v2455_v31 = vsel %vm355_vm5, %v2451_v27, -inf }
 0xe07   :  { %v2452_v30 = vsel %vm355_vm5, %v2450_v29, -inf }
 0xe84   :  { %v1891_v4 = vpop.xlane.xlu1 %1890 }
 0xe85   :  { %v1893_v12 = vsub.f32 %v1885_v55, %v1891_v4  ;;  %v1888_v9 = vpop.xlane.xlu0 %1887 }
 0xe86   :  { %v1892_v5 = vsub.f32 %v1884_v57, %v1888_v9  ;;  %v3401_v9 = vld [vmem:[%s4906_s4 + $0x20] sm:$0xff] }
 0xe87   :  { %v1896_v6 = vmul.f32 1.442695, %v1893_v12  ;;  %v3402_v12 = vld [vmem:[%s4906_s4 + $0x28] sm:$0xff] }
 0xe88   :  { %v1894_v7 = vmul.f32 1.442695, %v1892_v5 }
 0xe89   :  { %4144 = vpow2.f32 %v1896_v6 }
 0xe8a   :  { %4146 = vpow2.f32 %v1894_v7 }
 0xe8d   :  { %v2090_v8 = vpop.xlane.xlu0 %2089 }
 0xe8e   :  { %v2094_v10 = vsub.f32 %v2086_v62, %v2090_v8 }
 0xe90   :  { %v2096_v11 = vmul.f32 1.442695, %v2094_v10 }
 0xe91   :  { %v2093_v13 = vpop.xlane.xlu0 %2092 }
 0xe92   :  { %4148 = vpow2.f32 %v2096_v11  ;;  %v2095_v14 = vsub.f32 %v2087_v0, %v2093_v13 }
 0xe93   :  { %v4145_v15 = vpop.eup %4144 }
 0xe94   :  { %v4147_v16 = vpop.eup %4146  ;;  %v2098_v17 = vmul.f32 1.442695, %v2095_v14  ;;  %v1901_v21 = vsel %vm355_vm5, %v4145_v15, 0.0 }
 0xe95   :  { %1902 = vadd.xlane.f32.xlu0 %v1901_v21  ;;  %v1898_v22 = vsel %vm355_vm5, %v4147_v16, 0.0 }
 0xe96   :  { %4150 = vpow2.f32 %v2098_v17  ;;  %1899 = vadd.xlane.f32.xlu1 %v1898_v22 }
 0xe9c   :  { %v4149_v23 = vpop.eup %4148 }
 0xe9d   :  { %v2100_v25 = vsel %vm355_vm5, %v4149_v23, 0.0 }
 0xe9e   :  { %2101 = vadd.xlane.f32.xlu1 %v2100_v25 }
 0xea0   :  { %v4151_v26 = vpop.eup %4150 }
 0xea1   :  { %v2103_v19 = vsel %vm355_vm5, %v4151_v26, 0.0 }
 0xea2   :  { %2104 = vadd.xlane.f32.xlu0 %v2103_v19 }
 0xeaf   :  { %4080 = vrot.lane.b32.xlu1 %v4701_v34, %s4297_s26 }
 0xeb3   :  { %4090 = vrot.lane.b32.xlu1 %v4701_v34, %s4296_s9 }
 0xeb7   :  { %2644 = vrot.lane.b32.xlu1 %v4703_v35, %s4298_s22 }
 0xeb8   :  { %4085 = vrot.lane.b32.xlu0 %v4701_v34, %s4935_s3 }
 0xebc   :  { %2646 = vrot.lane.b32.xlu0 %v4715_v36, %s4298_s22  ;;  %s4937_s22 = smov 40  }
 0xedb   :  { %2453 = vmax.xlane.f32.xlu1 %v2452_v30  ;;  %2456 = vmax.xlane.f32.xlu0 %v2455_v31 }
 0xf22   :  { %v1903_v33 = vpop.xlane.xlu0 %1902 }
 0xf23   :  { %v1900_v32 = vpop.xlane.xlu1 %1899 }
 0xf24   :  { %4152 = vrcp.f32 %v1900_v32 }
 0xf25   :  { %4154 = vrcp.f32 %v1903_v33 }
 0xf2b   :  { %v2102_v35 = vpop.xlane.xlu1 %2101 }
 0xf2c   :  { %4156 = vrcp.f32 %v2102_v35 }
 0xf2e   :  { %v4153_v37 = vpop.eup %4152 }
 0xf2f   :  { %v4081_v36 = vpop.permute.xlu1 %4080  ;;  %v2105_v18 = vpop.xlane.xlu0 %2104  ;;  %v1906_v38 = vmul.f32 %v4153_v37, %v4147_v16 }
 0xf30   :  { %v4083_v39 = vunpack.i.h.bf16 %v4081_v36  ;;  %v4082_v40 = vunpack.i.l.bf16 %v4081_v36  ;;  %4158 = vrcp.f32 %v2105_v18  ;;  %v4155_v42 = vpop.eup %4154 }
 0xf31   :  { %3741 = vmatprep.mubr.msk.f32.mxu0 %vm355_vm5, %v1906_v38  ;;  %v1907_v52 = vmul.f32 %v4155_v42, %v4145_v15 }
 0xf32   :  { %v3929_v41 = vpack.c.bf16 %v4083_v39, %v4082_v40 }
 0xf33   :  { %v4091_v43 = vpop.permute.xlu1 %4090  ;;  %v4086_v44 = vpop.permute.xlu0 %4085 }
 0xf34   :  { %v4093_v47 = vunpack.i.h.bf16 %v4091_v43  ;;  %v4092_v48 = vunpack.i.l.bf16 %v4091_v43  ;;  %v4088_v49 = vunpack.i.h.bf16 %v4086_v44  ;;  %v4087_v50 = vunpack.i.l.bf16 %v4086_v44  ;;  %3930 = vmatprep.subr.bf16.mxu0 %v3929_v41 }
 0xf35   :  { %3932 = vmatpush3.bf16.msra.mxu0 %v3929_v41 }
 0xf36   :  { %v4157_v51 = vpop.eup %4156  ;;  %v3953_v53 = vpack.c.bf16 %v4093_v47, %v4092_v48  ;;  %v3939_v54 = vpack.c.bf16 %v4088_v49, %v4087_v50  ;;  %v3404_v50 = vld [vmem:[%s4906_s4 + $0x38] sm:$0xff] }
 0xf37   :  { %v2645_v55 = vpop.permute.xlu1 %2644  ;;  %v2108_v56 = vmul.f32 %v4157_v51, %v4149_v23  ;;  %v2647_v59 = vpop.permute.xlu0 %2646 }
 0xf38   :  { %3742 = vmatmul.mubr.msk.f32.vlgmr.msra.gmra.mrb[12].mxu0 %vm355_vm5, %v1907_v52  ;;  %3940 = vmatprep.subr.bf16.mxu0 %v3939_v54 }
 0xf39   :  { %3955 = vmatprep.subr.msk.bf16.mxu1 %vm4499_vm2, %v3953_v53  ;;  %3791 = vmatprep.mubr.msk.f32.mxu1 %vm267_vm1, %v2645_v55 }
 0xf3a   :  { %v4159_v57 = vpop.eup %4158  ;;  %3942 = vmatpush3.bf16.msra.mxu0 %v3939_v54  ;;  %3755 = vmatprep.mubr.msk.f32.mxu0 %vm355_vm5, %v2108_v56  ;;  %v3438_v56 = vld [vmem:[%s4907_s5 + $0x1] ss:$0 sm:$0xff] }
 0xf3b   :  { %v2109_v58 = vmul.f32 %v4159_v57, %v4151_v26  ;;  %3958 = vmatpush3.bf16.xpose.msk.msra.mxu1 %vm4499_vm2, %v3953_v53  ;;  %3758 = vmatprep.subr.mxu0 %v3402_v12 }
 0xf3d   :  { %3756 = vmatmul.mubr.msk.f32.vlgmr.msra.gmra.mrb[14].mxu0 %vm355_vm5, %v2109_v58 }
 0xf3e   :  { %3759 = vmatpush3.msra.mxu0 %v3402_v12 }
 0xf3f   :  { %3763 = vmatprep.subr.mxu0 %v3401_v9 }
 0xf42   :  { %3792 = vmatmul.mubr.msk.f32.vlgmr.msra.gmra.mrb[20].mxu1 %vm267_vm1, %v2647_v59 }
 0xf68   :  { %v2454_v60 = vpop.xlane.xlu1 %2453  ;;  %v2457_v61 = vpop.xlane.xlu0 %2456 }
 0xf69   :  { %v2458_v62 = vsub.f32 %v2450_v29, %v2454_v60  ;;  %v2459_v63 = vsub.f32 %v2451_v27, %v2457_v61 }
 0xf6b   :  { %v2460_v0 = vmul.f32 1.442695, %v2458_v62  ;;  %v2462_v1 = vmul.f32 1.442695, %v2459_v63 }
 0xf6d   :  { %4160 = vpow2.f32 %v2460_v0 }
 0xf6e   :  { %4162 = vpow2.f32 %v2462_v1 }
 0xf77   :  { %v4161_v2 = vpop.eup %4160 }
 0xf78   :  { %v4163_v3 = vpop.eup %4162  ;;  %v2464_v4 = vsel %vm355_vm5, %v4161_v2, 0.0 }
 0xf79   :  { %2465 = vadd.xlane.f32.xlu0 %v2464_v4  ;;  %v2467_v24 = vsel %vm355_vm5, %v4163_v3, 0.0 }
 0xf7a   :  { %2468 = vadd.xlane.f32.xlu1 %v2467_v24 }
 0xf8f   :  { %4095 = vrot.lane.b32.xlu0 %v4701_v34, %s4936_s0 }
0x1006   :  { %v2466_v5 = vpop.xlane.xlu0 %2465 }
0x1007   :  { %v2469_v10 = vpop.xlane.xlu1 %2468  ;;  %4164 = vrcp.f32 %v2466_v5 }
0x1008   :  { %4166 = vrcp.f32 %v2469_v10  ;;  %v3445_v10 = vld [vmem:[%s4910_s8 + $0x30] sm:$0xff] }
0x100a   :  { %v4096_v7 = vpop.permute.xlu0 %4095 }
0x100b   :  { %v3743_v6 = vpop.f32.mrb[12].mxu0  ;;  %v4098_v11 = vunpack.i.h.bf16 %v4096_v7  ;;  %v4097_v13 = vunpack.i.l.bf16 %v4096_v7  ;;  %v3444_v7 = vld [vmem:[%s4910_s8 + $0x28] sm:$0xff] }
0x100c   :  { %v1986_v8 = vpop.f32.mrb[13].mxu0 }
0x100d   :  { %v3949_v16 = vpack.c.bf16 %v4098_v11, %v4097_v13  ;;  %v3446_v11 = vld [vmem:[%s4910_s8 + $0x38] sm:$0xff] }
0x100e   :  { %v3967_v13 = vpack.c.bf16 %v3446_v11, %v3445_v10 }
0x1010   :  { %v3757_v14 = vpop.f32.mrb[14].mxu0 }
0x1011   :  { %v2188_v15 = vpop.f32.mrb[15].mxu0  ;;  %v4165_v22 = vpop.eup %4164 }
0x1012   :  { %3760 = vmatprep.mubr.msk.f32.mxu0 %vm267_vm1, %v2188_v15  ;;  %v4167_v19 = vpop.eup %4166  ;;  %v2472_v27 = vmul.f32 %v4165_v22, %v4161_v2  ;;  %v3451_v15 = vld [vmem:[%s4912_s10 + $0x48] sm:$0xff] }
0x1013   :  { %3761 = vmatmul.mubr.msk.f32.vlgmr.msra.gmra.mrb[16].mxu0 %vm267_vm1, %v3757_v14  ;;  %v2473_v30 = vmul.f32 %v4167_v19, %v4163_v3  ;;  %v3450_v14 = vld [vmem:[%s4912_s10 + $0x40] sm:$0xff] }
0x1014   :  { %3764 = vmatpush3.msra.mxu0 %v3401_v9  ;;  %3765 = vmatprep.mubr.msk.f32.mxu0 %vm267_vm1, %v1986_v8 }
0x1015   :  { %v3793_v17 = vpop.f32.mrb[20].mxu1  ;;  %3950 = vmatprep.subr.bf16.mxu0 %v3949_v16 }
0x1016   :  { %v2726_v21 = vpop.f32.mrb[21].mxu1  ;;  %v2736_v26 = vsel %vm4521_vm3, %v3793_v17, -1e+30  ;;  %v3971_v17 = vpack.c.bf16 %v3451_v15, %v3450_v14 }
0x1017   :  { %v2735_v23 = vsel %vm4525_vm4, %v2726_v21, -1e+30  ;;  %v2740_v29 = vsel %vm355_vm5, %v2736_v26, -inf  ;;  %v3453_v21 = vld [vmem:[%s4912_s10 + $0x58] sm:$0xff] }
0x1018   :  { %v2737_v25 = vsel %vm355_vm5, %v2735_v23, -inf }
0x1019   :  { %2738 = vmax.xlane.f32.xlu1 %v2737_v25  ;;  %v3455_v25 = vld [vmem:[%s4912_s10 + $0x68] sm:$0xff] }
0x101b   :  { %3766 = vmatmul.mubr.msk.f32.vlgmr.msra.gmra.mrb[16].mxu0 %vm267_vm1, %v3743_v6 }
0x101c   :  { %3952 = vmatpush3.bf16.msra.mxu0 %v3949_v16  ;;  %3779 = vmatprep.mubr.msk.f32.mxu0 %vm355_vm5, %v2472_v27  ;;  %v3452_v16 = vld [vmem:[%s4912_s10 + $0x50] sm:$0xff] }
0x101d   :  { %2741 = vmax.xlane.f32.xlu1 %v2740_v29  ;;  %3782 = vmatprep.subr.mxu0 %v3403_v46  ;;  %v3975_v22 = vpack.c.bf16 %v3453_v21, %v3452_v16 }
0x101f   :  { %3780 = vmatmul.mubr.msk.f32.vlgmr.msra.gmra.mrb[18].mxu0 %vm355_vm5, %v2473_v30 }
0x1020   :  { %3783 = vmatpush3.msra.mxu0 %v3403_v46 }
0x10a6   :  { %v2739_v45 = vpop.xlane.xlu1 %2738 }
0x10a7   :  { %v2743_v31 = vsub.f32 %v2735_v23, %v2739_v45  ;;  %v3454_v23 = vld [vmem:[%s4912_s10 + $0x60] sm:$0xff] }
0x10a9   :  { %v2745_v35 = vmul.f32 1.442695, %v2743_v31 }
0x10aa   :  { %v2742_v32 = vpop.xlane.xlu1 %2741 }
0x10ab   :  { %v2744_v33 = vsub.f32 %v2736_v26, %v2742_v32  ;;  %v3979_v26 = vpack.c.bf16 %v3455_v25, %v3454_v23  ;;  %v3440_v32 = vld [vmem:[%s4908_s6 + $0x1] ss:$0 sm:$0xff] }
0x10ac   :  { %v3229_v25 = vld [vmem:[%s4916_s14] sm:$0xff] }
0x10ad   :  { %v2747_v37 = vmul.f32 1.442695, %v2744_v33 }
0x10af   :  { %4168 = vpow2.f32 %v2747_v37 }
0x10b0   :  { %4170 = vpow2.f32 %v2745_v35  ;;  %v3442_v35 = vld [vmem:[%s4909_s7 + $0x1] ss:$0 sm:$0xff] }
0x10b9   :  { %v4169_v36 = vpop.eup %4168 }
0x10ba   :  { %v2752_v18 = vsel %vm355_vm5, %v4169_v36, 0.0  ;;  %v4171_v38 = vpop.eup %4170 }
0x10bb   :  { %2753 = vadd.xlane.f32.xlu1 %v2752_v18  ;;  %v2749_v39 = vsel %vm355_vm5, %v4171_v38, 0.0 }
0x10bf   :  { %2750 = vadd.xlane.f32.xlu1 %v2749_v39 }
0x10d0   :  { %4100 = vrot.lane.b32.xlu1 %v4701_v34, %s4937_s22 }
0x10f2   :  { %v3781_v40 = vpop.f32.mrb[18].mxu0 }
0x10f3   :  { %v2552_v41 = vpop.f32.mrb[19].mxu0 }
0x10f4   :  { %3784 = vmatprep.mubr.msk.f32.mxu0 %vm267_vm1, %v2552_v41  ;;  %v3456_v41 = vld [vmem:[%s4912_s10 + $0x70] sm:$0xff] }
0x10f5   :  { %3785 = vmatmul.mubr.msk.f32.vlgmr.msra.gmra.mrb[16].mxu0 %vm267_vm1, %v3781_v40 }
0x1148   :  { %v2754_v42 = vpop.xlane.xlu1 %2753 }
0x1149   :  { %4172 = vrcp.f32 %v2754_v42  ;;  %v3457_v42 = vld [vmem:[%s4912_s10 + $0x78] sm:$0xff] }
0x114c   :  { %v2751_v43 = vpop.xlane.xlu1 %2750 }
0x114d   :  { %4174 = vrcp.f32 %v2751_v43  ;;  %v3983_v43 = vpack.c.bf16 %v3457_v42, %v3456_v41 }
0x1150   :  { %v4101_v44 = vpop.permute.xlu1 %4100 }
0x1151   :  { %v4103_v47 = vunpack.i.h.bf16 %v4101_v44  ;;  %v4102_v48 = vunpack.i.l.bf16 %v4101_v44  ;;  %v3447_v44 = vld [vmem:[#allocation7 + $0x1] ss:$0 sm:$0xff] }
0x1153   :  { %v3959_v49 = vpack.c.bf16 %v4103_v47, %v4102_v48  ;;  %v4173_v34 = vpop.eup %4172 }
0x1154   :  { %v2758_v53 = vmul.f32 %v4173_v34, %v4169_v36 }
0x1155   :  { %3960 = vmatprep.subr.bf16.mxu0 %v3959_v49 }
0x1156   :  { %3962 = vmatpush3.bf16.msra.mxu0 %v3959_v49 }
0x1157   :  { %v4175_v51 = vpop.eup %4174  ;;  %3801 = vmatprep.subr.mxu0 %v3404_v50 }
0x1158   :  { %v2757_v52 = vmul.f32 %v4175_v51, %v4171_v38 }
0x115a   :  { %3798 = vmatprep.mubr.msk.f32.mxu0 %vm355_vm5, %v2757_v52  ;;  %v3458_v52 = vld [vmem:[#allocation8 + $0x1] ss:$0 sm:$0xff] }
0x115b   :  { %3799 = vmatmul.mubr.msk.f32.vlgmr.msra.gmra.mrb[20].mxu0 %vm355_vm5, %v2758_v53 }
0x115c   :  { %3802 = vmatpush3.msra.mxu0 %v3404_v50 }
0x115d   :  { %3972 = vmatprep.subr.bf16.mxu0 %v3971_v17 }
0x122e   :  { %v3800_v54 = vpop.f32.mrb[20].mxu0 }
0x122f   :  { %v2837_v55 = vpop.f32.mrb[21].mxu0 }
0x1230   :  { %3803 = vmatprep.mubr.msk.f32.mxu0 %vm267_vm1, %v2837_v55 }
0x1231   :  { %3804 = vmatmul.mubr.msk.f32.vlgmr.msra.gmra.mrb[16].mxu0 %vm267_vm1, %v3800_v54 }
0x1232   :  { %3974 = vmatpush3.bf16.msra.mxu0 %v3971_v17  ;;  %v3464_v17 = vld [vmem:[%s4915_s13 + $0x1] ss:$0 sm:$0xff] }
0x1233   :  { %3976 = vmatprep.subr.bf16.mxu0 %v3975_v22 }
0x1236   :  { %3978 = vmatpush3.bf16.msra.mxu0 %v3975_v22 }
0x1237   :  { %3980 = vmatprep.subr.bf16.mxu0 %v3979_v26 }
0x123a   :  { %3982 = vmatpush3.bf16.msra.mxu0 %v3979_v26  ;;  %v3230_v26 = vld [vmem:[%s4916_s14 + $0x8] sm:$0xff] }
0x123b   :  { %3984 = vmatprep.subr.bf16.mxu0 %v3983_v43 }
0x123e   :  { %3986 = vmatpush3.bf16.msra.mxu0 %v3983_v43 }
0x1304   :  { %v3805_v57 = vpop.f32.mrb[16].mxu0 }
0x1305   :  { %v2938_v58 = vadd.f32 %v3805_v57, %v3438_v56  ;;  %v2918_v59 = vpop.f32.mrb[17].mxu0 }
0x1306   :  { %v2937_v60 = vadd.f32 %v3438_v56, %v2918_v59 }
0x1307   :  { %v2940_v61 = vadd.f32 %v2938_v58, %v4694_v28 }
0x1308   :  { %v2939_v62 = vadd.f32 %v2937_v60, %v4690_v20  ;;  %v3443_v20 = vld [vmem:[%s4910_s8 + $0x20] sm:$0xff] }
0x1309   :  { %v2944_v63 = vsel %vm173_vm0, %v2940_v61, 0.0  ;;  %v3963_v8 = vpack.c.bf16 %v3444_v7, %v3443_v20 }
0x130a   :  { %2945 = vadd.xlane.f32.xlu1 %v2944_v63  ;;  %v2941_v0 = vsel %vm173_vm0, %v2939_v62, 0.0 }
0x130b   :  { %2942 = vadd.xlane.f32.xlu0 %v2941_v0  ;;  %3964 = vmatprep.subr.bf16.mxu1 %v3963_v8 }
0x130c   :  { %3966 = vmatpush3.bf16.msra.mxu1 %v3963_v8 }
0x130d   :  { %3968 = vmatprep.subr.bf16.mxu1 %v3967_v13 }
0x1310   :  { %3970 = vmatpush3.bf16.msra.mxu1 %v3967_v13  ;;  %v3462_v13 = vld [vmem:[%s4914_s12 + $0x1] ss:$0 sm:$0xff] }
0x1397   :  { %v2946_v1 = vpop.xlane.xlu1 %2945 }
0x1398   :  { %v2948_v2 = vmul.f32 0.03125, %v2946_v1  ;;  %v2943_v3 = vpop.xlane.xlu0 %2942 }
0x1399   :  { %v2947_v4 = vmul.f32 0.03125, %v2943_v3 }
0x139a   :  { %v2950_v24 = vsub.f32 %v2940_v61, %v2948_v2 }
0x139b   :  { %v2949_v12 = vsub.f32 %v2939_v62, %v2947_v4 }
0x139c   :  { %v2952_v6 = vmul.f32 %v2950_v24, %v2950_v24 }
0x139d   :  { %v2951_v9 = vmul.f32 %v2949_v12, %v2949_v12 }
0x139e   :  { %v2956_v28 = vsel %vm173_vm0, %v2952_v6, 0.0 }
0x139f   :  { %v2953_v5 = vsel %vm173_vm0, %v2951_v9, 0.0  ;;  %v4301_v9 = vmov 0.0|0.0  }
0x13a0   :  { %2954 = vadd.xlane.f32.xlu0 %v2953_v5  ;;  %3987 = vmatprep.subr.bf16.mxu1 %v4301_v9  ;;  %v4303_v5 = vmov 0.0  }
0x13a4   :  { %2957 = vadd.xlane.f32.xlu0 %v2956_v28 }
0x142d   :  { %v2955_v19 = vpop.xlane.xlu0 %2954 }
0x142e   :  { %v2959_v27 = vmul.f32 0.03125, %v2955_v19 }
0x1430   :  { %v2961_v29 = vadd.f32 1e-05, %v2959_v27 }
0x1431   :  { %v2958_v30 = vpop.xlane.xlu0 %2957 }
0x1432   :  { %4176 = vrsqrt.f32 %v2961_v29  ;;  %v2960_v46 = vmul.f32 0.03125, %v2958_v30 }
0x1434   :  { %v2962_v45 = vadd.f32 1e-05, %v2960_v46  ;;  %v3233_v46 = vld [vmem:[%s4918_s16] sm:$0x3] }
0x1436   :  { %4178 = vrsqrt.f32 %v2962_v45 }
0x143c   :  { %v4177_v31 = vpop.eup %4176 }
0x143d   :  { %v2965_v33 = vmul.f32 %v4177_v31, %v2949_v12 }
0x143f   :  { %v2975_v37 = vmul.f32 %v3440_v32, %v2965_v33  ;;  %v3466_v33 = vld [vmem:[#allocation2] ss:$0 sm:$0xff] }
0x1440   :  { %v4179_v36 = vpop.eup %4178 }
0x1441   :  { %v2966_v18 = vmul.f32 %v4179_v36, %v2950_v24  ;;  %v2985_v38 = vadd.f32 %v3442_v35, %v2975_v37 }
0x1443   :  { %v2976_v39 = vmul.f32 %v3440_v32, %v2966_v18  ;;  %3814 = vmatprep.mubr.msk.f32.mxu1 %vm173_vm0, %v2985_v38 }
0x1445   :  { %v2986_v40 = vadd.f32 %v3442_v35, %v2976_v39 }
0x1447   :  { %3815 = vmatmul.mubr.msk.f32.vlgmr.msra.gmra.mrb[22].mxu1 %vm173_vm0, %v2986_v40 }
0x1448   :  { %3840 = vmatprep.mubr.msk.f32.mxu1 %vm4302_vm7, %v4303_v5 }
0x151a   :  { %v3816_v47 = vpop.f32.mrb[22].mxu1 }
0x151b   :  { %v3078_v48 = vadd.f32 %v3816_v47, %v3447_v44  ;;  %v3072_v49 = vpop.f32.mrb[23].mxu1 }
0x151c   :  { %v3073_v50 = vadd.f32 %v3447_v44, %v3072_v49 }
0x151d   :  { %v3082_v51 = vmax.f32 %v3078_v48, 0.0 }
0x151e   :  { %v3081_v34 = vmax.f32 %v3073_v50, 0.0 }
0x1520   :  { %3833 = vmatprep.mubr.msk.f32.mxu0 %vm1564_vm6, %v3081_v34 }
0x1521   :  { %3834 = vmatmul.mubr.msk.f32.vlgmr.msra.gmra.mrb[22].mxu0 %vm1564_vm6, %v3082_v51 }
0x15f4   :  { %v3835_v53 = vpop.f32.mrb[22].mxu0 }
0x15f5   :  { %v3172_v54 = vpop.f32.mrb[23].mxu0  ;;  %v3178_v55 = vadd.f32 %v3835_v53, %v3458_v52 }
0x15f6   :  { %v3173_v56 = vadd.f32 %v3458_v52, %v3172_v54 }
0x15f7   :  { %v3182_v59 = vadd.f32 %v3178_v55, %v2986_v40 }
0x15f8   :  { %v3181_v57 = vadd.f32 %v3173_v56, %v2985_v38 }
0x15f9   :  { %v3186_v60 = vsel %vm173_vm0, %v3182_v59, 0.0 }
0x15fa   :  { %v3183_v58 = vsel %vm173_vm0, %v3181_v57, 0.0 }
0x15fb   :  { %3184 = vadd.xlane.f32.xlu0 %v3183_v58 }
0x15ff   :  { %3187 = vadd.xlane.f32.xlu0 %v3186_v60 }
0x1688   :  { %v3185_v61 = vpop.xlane.xlu0 %3184 }
0x1689   :  { %v3189_v62 = vmul.f32 0.03125, %v3185_v61 }
0x168b   :  { %v3191_v63 = vsub.f32 %v3181_v57, %v3189_v62 }
0x168c   :  { %v3188_v0 = vpop.xlane.xlu0 %3187 }
0x168d   :  { %v3190_v1 = vmul.f32 0.03125, %v3188_v0  ;;  %v3193_v2 = vmul.f32 %v3191_v63, %v3191_v63 }
0x168f   :  { %v3192_v3 = vsub.f32 %v3182_v59, %v3190_v1  ;;  %v3195_v4 = vsel %vm173_vm0, %v3193_v2, 0.0 }
0x1690   :  { %3196 = vadd.xlane.f32.xlu0 %v3195_v4 }
0x1691   :  { %v3194_v24 = vmul.f32 %v3192_v3, %v3192_v3 }
0x1693   :  { %v3198_v12 = vsel %vm173_vm0, %v3194_v24, 0.0 }
0x1694   :  { %3199 = vadd.xlane.f32.xlu1 %v3198_v12 }
0x171d   :  { %v3197_v6 = vpop.xlane.xlu0 %3196 }
0x171e   :  { %v3201_v28 = vmul.f32 0.03125, %v3197_v6 }
0x1720   :  { %v3203_v20 = vadd.f32 1e-05, %v3201_v28 }
0x1721   :  { %v3200_v7 = vpop.xlane.xlu1 %3199 }
0x1722   :  { %4180 = vrsqrt.f32 %v3203_v20  ;;  %v3202_v8 = vmul.f32 0.03125, %v3200_v7 }
0x1724   :  { %v3204_v10 = vadd.f32 1e-05, %v3202_v8 }
0x1726   :  { %4182 = vrsqrt.f32 %v3204_v10 }
0x172c   :  { %v4181_v11 = vpop.eup %4180 }
0x172d   :  { %v3207_v14 = vmul.f32 %v4181_v11, %v3191_v63 }
0x172f   :  { %v3217_v15 = vmul.f32 %v3462_v13, %v3207_v14 }
0x1730   :  { %v4183_v16 = vpop.eup %4182 }
0x1731   :  { %v3208_v21 = vmul.f32 %v4183_v16, %v3192_v3  ;;  %v3227_v23 = vadd.f32 %v3464_v17, %v3217_v15 }
0x1733   :  { %v3218_v22 = vmul.f32 %v3462_v13, %v3208_v21  ;;  %v3231_v27 = vmul.f32 %v3229_v25, %v3227_v23 }
0x1735   :  { %v3228_v19 = vadd.f32 %v3464_v17, %v3218_v22 }
0x1737   :  { %v3232_v29 = vmul.f32 %v3230_v26, %v3228_v19 }
0x1739   :  { %v3988_v30 = vpack.c.bf16 %v3232_v29, %v3231_v27 }
0x173b   :  { %3989 = vmatpush3.bf16.msra.mxu1 %v3988_v30 }
0x173e   :  { %3841 = vmatmul.mubr.msk.f32.vlgmr.msra.gmra.mrb[24].mxu1 %vm355_vm5, %v3233_v46 }
0x1811   :  { %v3303_v45 = vpop.f32.mrb[24].mxu1 }
0x1812   :  { %v3842_v31 = vpop.f32.mrb[25].mxu1  ;;  %v3308_v32 = vsel %vm3307_vm8, %v3303_v45, 0.0 }
0x1813   :  { %3309 = vadd.xlane.f32.xlu0 %v3308_v32 }
0x18a0   :  { %v3310_v35 = vpop.xlane.xlu0 %3309 }
0x18a1   :  { %v3318_v37 = vadd.f32 %v3466_v33, %v3310_v35 }
0x18a3   :  { %v3320_v36 = vsel %vm3319_vm9, %v3318_v37, -inf }
0x18a4   :  { %v3321_v18 = vrot.slane %v3320_v36, 4 }
0x18a6   :  { %v3322_v38 = vmax.f32 %v3320_v36, %v3321_v18 }
0x18a8   :  { %v3323_v39 = vrot.slane %v3322_v38, 2 }
0x18aa   :  { %v3324_v40 = vmax.f32 %v3322_v38, %v3323_v39 }
0x18ac   :  { %v3325_v41 = vrot.slane %v3324_v40, 1 }
0x18ae   :  { %v3326_v42 = vmax.f32 %v3324_v40, %v3325_v41 }
0x18b0   :  { %v3327_v43 = vsub.f32 %v3318_v37, %v3326_v42 }
0x18b2   :  { %v3328_v44 = vmul.f32 1.442695, %v3327_v43 }
0x18b4   :  { %4184 = vpow2.f32 %v3328_v44 }
0x18be   :  { %v4185_v47 = vpop.eup %4184 }
0x18bf   :  { %v3330_v48 = vsel %vm3319_vm9, %v4185_v47, 0.0 }
0x18c0   :  { %v3331_v49 = vrot.slane %v3330_v48, 4 }
0x18c2   :  { %v3332_v50 = vadd.f32 %v3331_v49, %v3330_v48 }
0x18c4   :  { %v3333_v34 = vrot.slane %v3332_v50, 2 }
0x18c6   :  { %v3334_v51 = vadd.f32 %v3333_v34, %v3332_v50 }
0x18c8   :  { %v3335_v52 = vrot.slane %v3334_v51, 1 }
0x18ca   :  { %v3336_v53 = vadd.f32 %v3335_v52, %v3334_v51 }
0x18cc   :  { %4186 = vrcp.f32 %v3336_v53 }
0x18d6   :  { %v4187_v54 = vpop.eup %4186 }
0x18d7   :  { %v3338_v55 = vmul.f32 %v4187_v54, %v4185_v47 }
0x18d9   :  { %3339 = vst.msk [vmem:[%s4919_s17] sm:$0x3] %vm3319_vm9, %v3338_v55 }
0x18da   :  { %3344 = vsyncpa [#allocation4], 1 }
0x18db   :  { %3345 = vsyncpa [#allocation6], 1 }
0x18dc   :  { %3346 = vsyncpa [#allocation9], 1 }

</bundles_post_ra>
